<compile_context>
chip_gen: v7x
topology: tpu7x:2x2x1
jax: 0.10.0
libtpu: 0.0.40
codegen_flags: <defaults>
</compile_context>

<pallas_src>
import functools

import numpy as np
import jax
import jax.numpy as jnp
from jax.experimental import pallas as pl
from jax.experimental.pallas import tpu as pltpu

N_BINS = 15
_LANE = 128

# Reference-only boundaries (torch.linspace(0, 1, n_bins + 1)).
_BOUNDARIES = np.linspace(0.0, 1.0, N_BINS + 1, dtype=np.float32)


def _ece_kernel(logits_ref, labels_ref, part_ref, *, n_rows):
    pid = pl.program_id(0)

    logits = logits_ref[...].astype(jnp.float32)          # (T, C)
    labels = labels_ref[...]                              # (T, 1) int32
    t, c = logits.shape

    # confidence without materializing softmax: max softmax prob == 1/denom
    row_max = jnp.max(logits, axis=1, keepdims=True)      # (T, 1)
    denom = jnp.sum(jnp.exp(logits - row_max), axis=1, keepdims=True)
    conf = 1.0 / denom                                    # (T, 1)

    # first-argmax on raw logits (argmax is softmax-invariant)
    col_idx = jax.lax.broadcasted_iota(jnp.int32, logits.shape, 1)
    is_max = logits == row_max
    preds = jnp.min(jnp.where(is_max, col_idx, c), axis=1, keepdims=True)
    acc = (preds == labels).astype(jnp.float32)           # (T, 1)

    # Mask ragged-tail rows on the narrow (T,1) path only.
    row_id = pid * t + jax.lax.broadcasted_iota(jnp.int32, (t, 1), 0)
    valid = row_id < n_rows
    diff = jnp.where(valid, conf - acc, 0.0)               # (T, 1)

    # Uniform-width binning: bin k iff conf in (k/15, (k+1)/15].
    bin_idx = jnp.clip(
        jnp.ceil(conf * float(N_BINS)).astype(jnp.int32) - 1, 0, N_BINS - 1)
    lane = jax.lax.broadcasted_iota(jnp.int32, (t, _LANE), 1)
    in_bin = lane == bin_idx                               # (T, 128) one-hot

    # Lane-dense signed per-bin partial sums of (conf - acc) for this tile.
    part_ref[...] = jnp.sum(jnp.where(in_bin, diff, 0.0), axis=0, keepdims=True)


def _round_up(x, m):
    return ((x + m - 1) // m) * m


def ece_loss(logits, labels, *, tile_n=None, vmem_budget_bytes=12 * 1024 * 1024):
    """logits: (N, C) float, labels: (N,) int. Returns (1,) float32 ECE."""
    n, c = logits.shape
    itemsize = jnp.dtype(logits.dtype).itemsize

    # Real VMEM footprint per row: lane-padded logits block (double-buffered)
    # plus the lane-padded int32 labels block (double-buffered).
    lane_c = _round_up(c, _LANE)
    bytes_per_row = 2 * lane_c * itemsize + 2 * _LANE * 4
    max_rows = max(32, vmem_budget_bytes // bytes_per_row)

    if tile_n is None:
        tile_n = max_rows
    else:
        tile_n = min(int(tile_n), max_rows)

    if tile_n >= n:
        tile_n = n                       # full-extent block (always valid)
    else:
        tile_n = max(32, (tile_n // 32) * 32)   # 32 covers f32 & bf16 sublanes

    num_tiles = pl.cdiv(n, tile_n)
    labels2d = labels.astype(jnp.int32).reshape(n, 1)

    kernel = functools.partial(_ece_kernel, n_rows=n)

    partials = pl.pallas_call(
        kernel,
        out_shape=jax.ShapeDtypeStruct((num_tiles, _LANE), jnp.float32),
        grid=(num_tiles,),
        in_specs=[
            pl.BlockSpec((tile_n, c), lambda i: (i, 0)),
            pl.BlockSpec((tile_n, 1), lambda i: (i, 0)),
        ],
        out_specs=pl.BlockSpec((1, _LANE), lambda i: (i, 0)),
        compiler_params=pltpu.CompilerParams(
            dimension_semantics=("parallel",)),
    )(logits, labels2d)

    # Finalize in plain JAX: |sum_in_bin(conf) - sum_in_bin(acc)| / N, summed
    # over bins (lanes >= 15 are exactly zero by construction).
    bin_sums = jnp.sum(partials, axis=0)                   # (128,)
    ece = jnp.sum(jnp.abs(bin_sums)) / jnp.float32(n)
    return ece.reshape(1)


def _ece_reference(logits, labels):
    """Pure-JAX reference mirroring the PyTorch module semantics."""
    softmaxes = jax.nn.softmax(logits.astype(jnp.float32), axis=1)
    confidences = jnp.max(softmaxes, axis=1)
    predictions = jnp.argmax(softmaxes, axis=1)
    accuracies = (predictions == labels).astype(jnp.float32)
    n = logits.shape[0]
    ece = jnp.zeros((1,), jnp.float32)
    for i in range(N_BINS):
        lo = float(_BOUNDARIES[i])
        hi = float(_BOUNDARIES[i + 1])
        in_bin = jnp.logical_and(confidences > lo, confidences <= hi)
        cnt = jnp.sum(in_bin.astype(jnp.float32))
        prop = cnt / n
        safe = jnp.maximum(cnt, 1.0)
        avg_conf = jnp.sum(jnp.where(in_bin, confidences, 0.0)) / safe
        avg_acc = jnp.sum(jnp.where(in_bin, accuracies, 0.0)) / safe
        ece = ece + jnp.where(cnt > 0, jnp.abs(avg_conf - avg_acc) * prop, 0.0)
    return ece


if __name__ == "__main__":
    key = jax.random.PRNGKey(0)
    k1, k2, k3, k4, k5, k6 = jax.random.split(key, 6)

    # Case 1: single full-extent tile (grid = 1), auto tile sizing.
    N, C = 256, 16
    logits = jax.random.normal(k1, (N, C), dtype=jnp.float32) * 3.0
    labels = jax.random.randint(k2, (N,), 0, C, dtype=jnp.int32)
    ece = jax.block_until_ready(ece_loss(logits, labels))
    ref = jax.block_until_ready(_ece_reference(logits, labels))
    assert ece.shape == (1,)
    np.testing.assert_allclose(np.asarray(ece), np.asarray(ref),
                               rtol=1e-4, atol=1e-6)

    # Case 2: forced small tile -> multi-step "parallel" grid + ragged tail.
    N2, C2 = 200, 10
    logits2 = jax.random.normal(k3, (N2, C2), dtype=jnp.float32) * 2.0
    labels2 = jax.random.randint(k4, (N2,), 0, C2, dtype=jnp.int32)
    ece2 = jax.block_until_ready(ece_loss(logits2, labels2, tile_n=64))
    ref2 = jax.block_until_ready(_ece_reference(logits2, labels2))
    np.testing.assert_allclose(np.asarray(ece2), np.asarray(ref2),
                               rtol=1e-4, atol=1e-6)

    # Case 3: bf16 logits streamed directly (on-chip f32 upcast), ragged N.
    N3, C3 = 300, 12
    logits3 = (jax.random.normal(k5, (N3, C3), dtype=jnp.float32) * 2.5
               ).astype(jnp.bfloat16)
    labels3 = jax.random.randint(k6, (N3,), 0, C3, dtype=jnp.int32)
    ece3 = jax.block_until_ready(ece_loss(logits3, labels3, tile_n=96))
    ref3 = jax.block_until_ready(_ece_reference(logits3, labels3))
    np.testing.assert_allclose(np.asarray(ece3), np.asarray(ref3),
                               rtol=1e-4, atol=1e-6)

    print("KERNEL_OK")
</pallas_src>

<mosaic_0001>
module attributes {stable_mosaic.version = 11 : i64} {
  func.func @_ece_kernel(%arg0: i32, %arg1: memref<256x16xf32, #tpu.memory_space<vmem>>, %arg2: memref<256x1xi32, #tpu.memory_space<vmem>>, %arg3: memref<1x128xf32, #tpu.memory_space<vmem>>) attributes {dimension_semantics = [#tpu.dimension_semantics<parallel>], iteration_bounds = array<i64: 1>, scalar_prefetch = 0 : i64, scratch_operands = 0 : i64, tpu.core_type = #tpu.core_type<tc>, window_params = [{transform_indices = @transform_0, window_bounds = array<i64: 256, 16>}, {transform_indices = @transform_1, window_bounds = array<i64: 256, 1>}, {transform_indices = @transform_2, window_bounds = array<i64: 1, 128>}]} {
    %c0 = arith.constant 0 : index
    %c0_0 = arith.constant 0 : index
    %0 = vector.load %arg1[%c0, %c0_0] : memref<256x16xf32, #tpu.memory_space<vmem>>, vector<256x16xf32>
    %c0_1 = arith.constant 0 : index
    %c0_2 = arith.constant 0 : index
    %1 = vector.load %arg2[%c0_1, %c0_2] : memref<256x1xi32, #tpu.memory_space<vmem>>, vector<256x1xi32>
    %cst = arith.constant dense<0xFF800000> : vector<256xf32>
    %2 = vector.multi_reduction <maximumf>, %0, %cst [1] : vector<256x16xf32> to vector<256xf32>
    %3 = vector.shape_cast %2 : vector<256xf32> to vector<256x1xf32>
    %4 = vector.broadcast %3 : vector<256x1xf32> to vector<256x16xf32>
    %5 = arith.subf %0, %4 : vector<256x16xf32>
    %6 = math.exp %5 : vector<256x16xf32>
    %cst_3 = arith.constant dense<0.000000e+00> : vector<256xf32>
    %7 = vector.multi_reduction <add>, %6, %cst_3 [1] : vector<256x16xf32> to vector<256xf32>
    %8 = vector.shape_cast %7 : vector<256xf32> to vector<256x1xf32>
    %cst_4 = arith.constant 1.000000e+00 : f32
    %9 = vector.broadcast %cst_4 : f32 to vector<256x1xf32>
    %10 = arith.divf %9, %8 : vector<256x1xf32>
    %11 = tpu.iota {dimensions = array<i32: 1>} : vector<256x16xi32>
    %12 = vector.broadcast %3 : vector<256x1xf32> to vector<256x16xf32>
    %13 = arith.cmpf oeq, %0, %12 : vector<256x16xf32>
    %c16_i32 = arith.constant 16 : i32
    %14 = vector.broadcast %c16_i32 : i32 to vector<256x16xi32>
    %15 = arith.select %13, %11, %14 : vector<256x16xi1>, vector<256x16xi32>
    %cst_5 = arith.constant dense<2147483647> : vector<256xi32>
    %16 = vector.multi_reduction <minsi>, %15, %cst_5 [1] : vector<256x16xi32> to vector<256xi32>
    %17 = vector.shape_cast %16 : vector<256xi32> to vector<256x1xi32>
    %18 = arith.cmpi eq, %17, %1 : vector<256x1xi32>
    %19 = arith.extui %18 : vector<256x1xi1> to vector<256x1xi32>
    %20 = arith.sitofp %19 : vector<256x1xi32> to vector<256x1xf32>
    %c256_i32 = arith.constant 256 : i32
    %21 = arith.muli %arg0, %c256_i32 : i32
    %22 = tpu.iota {dimensions = array<i32: 0>} : vector<256x1xi32>
    %23 = vector.broadcast %21 : i32 to vector<256x1xi32>
    %24 = arith.addi %23, %22 : vector<256x1xi32>
    %c256_i32_6 = arith.constant 256 : i32
    %25 = vector.broadcast %c256_i32_6 : i32 to vector<256x1xi32>
    %26 = arith.cmpi slt, %24, %25 : vector<256x1xi32>
    %27 = arith.subf %10, %20 : vector<256x1xf32>
    %cst_7 = arith.constant 0.000000e+00 : f32
    %28 = vector.broadcast %cst_7 : f32 to vector<256x1xf32>
    %29 = arith.select %26, %27, %28 : vector<256x1xi1>, vector<256x1xf32>
    %cst_8 = arith.constant 1.500000e+01 : f32
    %30 = vector.broadcast %cst_8 : f32 to vector<256x1xf32>
    %31 = arith.mulf %10, %30 : vector<256x1xf32>
    %32 = math.ceil %31 : vector<256x1xf32>
    %33 = arith.fptosi %32 : vector<256x1xf32> to vector<256x1xi32>
    %c1_i32 = arith.constant 1 : i32
    %34 = vector.broadcast %c1_i32 : i32 to vector<256x1xi32>
    %35 = arith.subi %33, %34 : vector<256x1xi32>
    %c0_i32 = arith.constant 0 : i32
    %c14_i32 = arith.constant 14 : i32
    %36 = vector.broadcast %c0_i32 : i32 to vector<256x1xi32>
    %37 = arith.maxsi %36, %35 : vector<256x1xi32>
    %38 = vector.broadcast %c14_i32 : i32 to vector<256x1xi32>
    %39 = arith.minsi %38, %37 : vector<256x1xi32>
    %40 = tpu.iota {dimensions = array<i32: 1>} : vector<256x128xi32>
    %41 = vector.broadcast %39 : vector<256x1xi32> to vector<256x128xi32>
    %42 = arith.cmpi eq, %40, %41 : vector<256x128xi32>
    %cst_9 = arith.constant 0.000000e+00 : f32
    %43 = vector.shape_cast %29 : vector<256x1xf32> to vector<256x1xf32>
    %44 = vector.broadcast %43 : vector<256x1xf32> to vector<256x128xf32>
    %45 = vector.broadcast %cst_9 : f32 to vector<256x128xf32>
    %46 = arith.select %42, %44, %45 : vector<256x128xi1>, vector<256x128xf32>
    %cst_10 = arith.constant dense<0.000000e+00> : vector<128xf32>
    %47 = vector.multi_reduction <add>, %46, %cst_10 [0] : vector<256x128xf32> to vector<128xf32>
    %48 = vector.shape_cast %47 : vector<128xf32> to vector<1x128xf32>
    %c0_11 = arith.constant 0 : index
    %c0_12 = arith.constant 0 : index
    %49 = vector.load %arg3[%c0_11, %c0_12] : memref<1x128xf32, #tpu.memory_space<vmem>>, vector<1x128xf32>
    tpu.vector_store %arg3[%c0_11, %c0_12], %48 {strides = array<i32>} : memref<1x128xf32, #tpu.memory_space<vmem>>, vector<1x128xf32>,
    return
  }
  func.func @transform_0(%arg0: i32) -> (i32, i32) {
    %c0_i32 = arith.constant 0 : i32
    %c0_i32_0 = arith.constant 0 : i32
    return %arg0, %c0_i32 : i32, i32
  }
  func.func @transform_1(%arg0: i32) -> (i32, i32) {
    %c0_i32 = arith.constant 0 : i32
    %c0_i32_0 = arith.constant 0 : i32
    return %arg0, %c0_i32 : i32, i32
  }
  func.func @transform_2(%arg0: i32) -> (i32, i32) {
    %c0_i32 = arith.constant 0 : i32
    %c0_i32_0 = arith.constant 0 : i32
    return %arg0, %c0_i32 : i32, i32
  }
}

</mosaic_0001>

<bundles_post_ra>
// kernel: tpu_custom_call.1
= control target key start
LH: loop header
LB: loop body
LE: loop exit
PB: predicated region body
PF: predicated region fallthrough
CT: control target
= control target key end

     0   :  { %vm76_vm0 = vcmask 130048   ;;  %s3464_s0 = inlined_call_operand.vmem [shape: f32[256,16], index: 0, kind: input, shape index: {}]   ;;  %s3465_s1 = inlined_call_operand.vmem [shape: s32[256,1], index: 1, kind: input, shape index: {}]   ;;  %s3466_s2 = inlined_call_operand.hbm [shape: f32[1,128], index: 2, kind: output, shape index: {}]  }
   0x1   :  { %v2073_v0 = vld [vmem:[%s3464_s0] sm:$0xff]  ;;  %v2078_v1 = vld [vmem:[%s3464_s0 + $0x10] sm:$0xff]  ;;  %v2083_v2 = vld [vmem:[%s3464_s0 + $0x8] sm:$0xff] }
   0x2   :  { %v77_v3 = vsel %vm76_vm0, %v2073_v0, -inf  ;;  %v83_v4 = vsel %vm76_vm0, %v2078_v1, -inf  ;;  %v2092_v5 = vld [vmem:[%s3464_s0 + $0x18] sm:$0xff]  ;;  %v80_v6 = vsel %vm76_vm0, %v2083_v2, -inf  ;;  %v2101_v8 = vld [vmem:[%s3464_s0 + $0x20] sm:$0xff]  ;;  %v2106_v9 = vld [vmem:[%s3464_s0 + $0x28] sm:$0xff] }
   0x3   :  { %78 = vmax.xlane.f32.xlu0 %v77_v3  ;;  %84 = vmax.xlane.f32.xlu1 %v83_v4  ;;  %v86_v7 = vsel %vm76_vm0, %v2092_v5, -inf  ;;  %v89_v10 = vsel %vm76_vm0, %v2101_v8, -inf  ;;  %v92_v11 = vsel %vm76_vm0, %v2106_v9, -inf  ;;  %v2115_v12 = vld [vmem:[%s3464_s0 + $0x30] sm:$0xff]  ;;  %v2120_v13 = vld [vmem:[%s3464_s0 + $0x38] sm:$0xff] }
   0x4   :  { %v95_v14 = vsel %vm76_vm0, %v2115_v12, -inf  ;;  %v98_v15 = vsel %vm76_vm0, %v2120_v13, -inf }
   0x7   :  { %81 = vmax.xlane.f32.xlu0 %v80_v6  ;;  %87 = vmax.xlane.f32.xlu1 %v86_v7 }
   0xb   :  { %90 = vmax.xlane.f32.xlu0 %v89_v10  ;;  %93 = vmax.xlane.f32.xlu1 %v92_v11 }
   0xc   :  { %7 = vsyncpa [#allocation3], 0  ;;  %v2129_v16 = vld [vmem:[%s3464_s0 + $0x40] sm:$0xff]  ;;  %v2134_v17 = vld [vmem:[%s3464_s0 + $0x48] sm:$0xff]  ;;  %v429_v3 = vlaneseq }
   0xd   :  { %v101_v18 = vsel %vm76_vm0, %v2129_v16, -inf  ;;  %v104_v19 = vsel %vm76_vm0, %v2134_v17, -inf  ;;  %v2143_v20 = vld [vmem:[%s3464_s0 + $0x50] sm:$0xff]  ;;  %v2148_v21 = vld [vmem:[%s3464_s0 + $0x58] sm:$0xff]  ;;  %v2157_v24 = vld [vmem:[%s3464_s0 + $0x60] sm:$0xff] }
   0xe   :  { %v107_v22 = vsel %vm76_vm0, %v2143_v20, -inf  ;;  %v110_v23 = vsel %vm76_vm0, %v2148_v21, -inf  ;;  %v2162_v25 = vld [vmem:[%s3464_s0 + $0x68] sm:$0xff]  ;;  %v113_v26 = vsel %vm76_vm0, %v2157_v24, -inf  ;;  %v2171_v28 = vld [vmem:[%s3464_s0 + $0x70] sm:$0xff]  ;;  %v2176_v29 = vld [vmem:[%s3464_s0 + $0x78] sm:$0xff] }
   0xf   :  { %96 = vmax.xlane.f32.xlu0 %v95_v14  ;;  %99 = vmax.xlane.f32.xlu1 %v98_v15  ;;  %v116_v27 = vsel %vm76_vm0, %v2162_v25, -inf  ;;  %v119_v30 = vsel %vm76_vm0, %v2171_v28, -inf  ;;  %v122_v31 = vsel %vm76_vm0, %v2176_v29, -inf  ;;  %v2185_v32 = vld [vmem:[%s3464_s0 + $0x80] sm:$0xff]  ;;  %v2190_v33 = vld [vmem:[%s3464_s0 + $0x88] sm:$0xff]  ;;  %v2199_v36 = vld [vmem:[%s3464_s0 + $0x90] sm:$0xff] }
  0x10   :  { %v125_v34 = vsel %vm76_vm0, %v2185_v32, -inf  ;;  %v128_v35 = vsel %vm76_vm0, %v2190_v33, -inf  ;;  %v2204_v37 = vld [vmem:[%s3464_s0 + $0x98] sm:$0xff]  ;;  %v131_v38 = vsel %vm76_vm0, %v2199_v36, -inf  ;;  %v2213_v40 = vld [vmem:[%s3464_s0 + $0xa0] sm:$0xff]  ;;  %v2218_v41 = vld [vmem:[%s3464_s0 + $0xa8] sm:$0xff] }
  0x11   :  { %v134_v39 = vsel %vm76_vm0, %v2204_v37, -inf  ;;  %v137_v42 = vsel %vm76_vm0, %v2213_v40, -inf  ;;  %v140_v43 = vsel %vm76_vm0, %v2218_v41, -inf  ;;  %v2227_v44 = vld [vmem:[%s3464_s0 + $0xb0] sm:$0xff]  ;;  %v2232_v45 = vld [vmem:[%s3464_s0 + $0xb8] sm:$0xff]  ;;  %v2241_v48 = vld [vmem:[%s3464_s0 + $0xc0] sm:$0xff] }
  0x12   :  { %v143_v46 = vsel %vm76_vm0, %v2227_v44, -inf  ;;  %v146_v47 = vsel %vm76_vm0, %v2232_v45, -inf  ;;  %v2246_v49 = vld [vmem:[%s3464_s0 + $0xc8] sm:$0xff]  ;;  %v149_v50 = vsel %vm76_vm0, %v2241_v48, -inf  ;;  %v2255_v52 = vld [vmem:[%s3464_s0 + $0xd0] sm:$0xff]  ;;  %v2260_v53 = vld [vmem:[%s3464_s0 + $0xd8] sm:$0xff] }
  0x13   :  { %102 = vmax.xlane.f32.xlu0 %v101_v18  ;;  %105 = vmax.xlane.f32.xlu1 %v104_v19  ;;  %v152_v51 = vsel %vm76_vm0, %v2246_v49, -inf  ;;  %v155_v54 = vsel %vm76_vm0, %v2255_v52, -inf  ;;  %v158_v55 = vsel %vm76_vm0, %v2260_v53, -inf  ;;  %v2269_v56 = vld [vmem:[%s3464_s0 + $0xe0] sm:$0xff]  ;;  %v2274_v57 = vld [vmem:[%s3464_s0 + $0xe8] sm:$0xff]  ;;  %v2283_v60 = vld [vmem:[%s3464_s0 + $0xf0] sm:$0xff] }
  0x14   :  { %3530 = vst [vmem:[#allocation5_spill] sm:$0xff] %v2274_v57  ;;  %v161_v58 = vsel %vm76_vm0, %v2269_v56, -inf  ;;  %v164_v59 = vsel %vm76_vm0, %v2274_v57, -inf  ;;  %3531 = vst [vmem:[#allocation6_spill] sm:$0xff] %v2283_v60  ;;  %v2288_v61 = vld [vmem:[%s3464_s0 + $0xf8] sm:$0xff]  ;;  %v167_v62 = vsel %vm76_vm0, %v2283_v60, -inf }
  0x15   :  { %3532 = vst [vmem:[#allocation7_spill] sm:$0xff] %v2288_v61  ;;  %v170_v63 = vsel %vm76_vm0, %v2288_v61, -inf  ;;  %v2294_v4 = vand.u32 127, %v429_v3 }
  0x17   :  { %108 = vmax.xlane.f32.xlu0 %v107_v22  ;;  %111 = vmax.xlane.f32.xlu1 %v110_v23  ;;  %3533 = vst [vmem:[#allocation8_spill] sm:$0xff] %v2294_v4 }
  0x1b   :  { %114 = vmax.xlane.f32.xlu0 %v113_v26  ;;  %117 = vmax.xlane.f32.xlu1 %v116_v27 }
  0x1f   :  { %120 = vmax.xlane.f32.xlu0 %v119_v30  ;;  %123 = vmax.xlane.f32.xlu1 %v122_v31 }
  0x23   :  { %126 = vmax.xlane.f32.xlu0 %v125_v34  ;;  %129 = vmax.xlane.f32.xlu1 %v128_v35 }
  0x27   :  { %132 = vmax.xlane.f32.xlu0 %v131_v38  ;;  %135 = vmax.xlane.f32.xlu1 %v134_v39 }
  0x2b   :  { %138 = vmax.xlane.f32.xlu0 %v137_v42  ;;  %141 = vmax.xlane.f32.xlu1 %v140_v43 }
  0x2f   :  { %144 = vmax.xlane.f32.xlu0 %v143_v46  ;;  %147 = vmax.xlane.f32.xlu1 %v146_v47 }
  0x33   :  { %150 = vmax.xlane.f32.xlu0 %v149_v50  ;;  %153 = vmax.xlane.f32.xlu1 %v152_v51 }
  0x37   :  { %156 = vmax.xlane.f32.xlu0 %v155_v54  ;;  %159 = vmax.xlane.f32.xlu1 %v158_v55 }
  0x3b   :  { %162 = vmax.xlane.f32.xlu0 %v161_v58  ;;  %165 = vmax.xlane.f32.xlu1 %v164_v59 }
  0x3f   :  { %168 = vmax.xlane.f32.xlu0 %v167_v62  ;;  %171 = vmax.xlane.f32.xlu1 %v170_v63 }
  0x90   :  { %v2296_v6 = vpop.xlane.xlu0 %78  ;;  %v2298_v7 = vpop.xlane.xlu1 %84 }
  0x91   :  { %vm431_vm1 = vcmp.eq.f32.partialorder %v2073_v0, %v2296_v6  ;;  %vm433_vm2 = vcmp.eq.f32.partialorder %v2078_v1, %v2298_v7 }
  0x92   :  { %v463_v10 = vsel %vm431_vm1, %v2294_v4, 16  ;;  %v465_v11 = vsel %vm433_vm2, %v2294_v4, 16 }
  0x93   :  { %v2307_v14 = vsel %vm76_vm0, %v463_v10, 2147483647  ;;  %v2315_v22 = vsel %vm76_vm0, %v465_v11, 2147483647 }
  0x94   :  { %3534 = vst [vmem:[#allocation9_spill] sm:$0xff] %v2307_v14  ;;  %v2309_v15 = vpop.xlane.xlu0 %81  ;;  %v2311_v18 = vpop.xlane.xlu1 %87  ;;  %v497_v19 = vshra.s32 %v2307_v14, 16  ;;  %3535 = vst [vmem:[#allocation10_spill] sm:$0xff] %v2315_v22  ;;  %v527_v26 = vshra.s32 %v2315_v22, 16 }
  0x95   :  { %vm432_vm3 = vcmp.eq.f32.partialorder %v2083_v2, %v2309_v15  ;;  %vm434_vm4 = vcmp.eq.f32.partialorder %v2092_v5, %v2311_v18 }
  0x96   :  { %v2321_v23 = vcvt.s32.f32 %v497_v19  ;;  %v464_v27 = vsel %vm432_vm3, %v2294_v4, 16  ;;  %v466_v30 = vsel %vm434_vm4, %v2294_v4, 16  ;;  %v2331_v35 = vcvt.s32.f32 %v527_v26 }
  0x97   :  { %v2334_v38 = vsel %vm76_vm0, %v464_v27, 2147483647  ;;  %v2337_v39 = vsel %vm76_vm0, %v466_v30, 2147483647 }
  0x98   :  { %3536 = vst [vmem:[#allocation11_spill] sm:$0xff] %v2321_v23  ;;  %500 = vmin.xlane.f32.xlu0 %v2321_v23  ;;  %v2327_v31 = vpop.xlane.xlu0 %90  ;;  %v2329_v34 = vpop.xlane.xlu1 %93  ;;  %3537 = vst [vmem:[#allocation12_spill] sm:$0xff] %v2331_v35  ;;  %v512_v42 = vshra.s32 %v2334_v38, 16  ;;  %v542_v43 = vshra.s32 %v2337_v39, 16 }
  0x99   :  { %3538 = vst [vmem:[#allocation13_spill] sm:$0xff] %v2334_v38  ;;  %3539 = vst [vmem:[#allocation14_spill] sm:$0xff] %v2337_v39  ;;  %vm435_vm5 = vcmp.eq.f32.partialorder %v2101_v8, %v2327_v31  ;;  %vm436_vm6 = vcmp.eq.f32.partialorder %v2106_v9, %v2329_v34 }
  0x9a   :  { %v2346_v46 = vcvt.s32.f32 %v512_v42  ;;  %v467_v51 = vsel %vm435_vm5, %v2294_v4, 16  ;;  %v468_v54 = vsel %vm436_vm6, %v2294_v4, 16  ;;  %v2359_v55 = vcvt.s32.f32 %v542_v43 }
  0x9b   :  { %v2362_v58 = vsel %vm76_vm0, %v467_v51, 2147483647  ;;  %v2371_v10 = vsel %vm76_vm0, %v468_v54, 2147483647 }
  0x9c   :  { %530 = vmin.xlane.f32.xlu0 %v2331_v35  ;;  %3540 = vst [vmem:[#allocation15_spill] sm:$0xff] %v2346_v46  ;;  %v2348_v47 = vpop.xlane.xlu0 %96  ;;  %v2350_v50 = vpop.xlane.xlu1 %99  ;;  %515 = vmin.xlane.f32.xlu1 %v2346_v46  ;;  %3541 = vst [vmem:[#allocation16_spill] sm:$0xff] %v2359_v55  ;;  %v557_v59 = vshra.s32 %v2362_v58, 16  ;;  %v572_v27 = vshra.s32 %v2371_v10, 16 }
  0x9d   :  { %vm437_vm7 = vcmp.eq.f32.partialorder %v2115_v12, %v2348_v47  ;;  %vm438_vm8 = vcmp.eq.f32.partialorder %v2120_v13, %v2350_v50  ;;  %3542 = vst [vmem:[#allocation17_spill] sm:$0xff] %v2362_v58  ;;  %3543 = vst [vmem:[#allocation18_spill] sm:$0xff] %v2371_v10 }
  0x9e   :  { %v469_v62 = vsel %vm437_vm7, %v2294_v4, 16  ;;  %v470_v19 = vsel %vm438_vm8, %v2294_v4, 16  ;;  %v2377_v26 = vcvt.s32.f32 %v557_v59 }
  0x9f   :  { %v2374_v11 = vsel %vm76_vm0, %v469_v62, 2147483647  ;;  %v2386_v42 = vsel %vm76_vm0, %v470_v19, 2147483647  ;;  %v2396_v62 = vcvt.s32.f32 %v572_v27 }
  0xa0   :  { %v2366_v63 = vpop.xlane.xlu0 %102  ;;  %v2368_v3 = vpop.xlane.xlu1 %105  ;;  %3544 = vst [vmem:[#allocation19_spill] sm:$0xff] %v2374_v11  ;;  %3545 = vst [vmem:[#allocation20_spill] sm:$0xff] %v2377_v26  ;;  %545 = vmin.xlane.f32.xlu1 %v2359_v55  ;;  %560 = vmin.xlane.f32.xlu0 %v2377_v26  ;;  %v587_v30 = vshra.s32 %v2374_v11, 16  ;;  %v602_v54 = vshra.s32 %v2386_v42, 16 }
  0xa1   :  { %vm439_vm9 = vcmp.eq.f32.partialorder %v2129_v16, %v2366_v63  ;;  %3546 = vst [vmem:[#allocation21_spill] sm:$0xff] %v2386_v42  ;;  %vm440_vm10 = vcmp.eq.f32.partialorder %v2134_v17, %v2368_v3  ;;  %3547 = vst [vmem:[#allocation22_spill] sm:$0xff] %v2396_v62 }
  0xa2   :  { %v471_v59 = vsel %vm439_vm9, %v2294_v4, 16  ;;  %v2398_v26 = vcvt.s32.f32 %v587_v30  ;;  %v2402_v19 = vcvt.s32.f32 %v602_v54  ;;  %v472_v55 = vsel %vm440_vm10, %v2294_v4, 16 }
  0xa3   :  { %v2405_v11 = vsel %vm76_vm0, %v471_v59, 2147483647 }
  0xa4   :  { %v2390_v43 = vpop.xlane.xlu0 %108  ;;  %v2392_v51 = vpop.xlane.xlu1 %111  ;;  %3548 = vst [vmem:[#allocation23_spill] sm:$0xff] %v2398_v26  ;;  %575 = vmin.xlane.f32.xlu1 %v2396_v62  ;;  %590 = vmin.xlane.f32.xlu0 %v2398_v26  ;;  %3549 = vst [vmem:[#allocation24_spill] sm:$0xff] %v2402_v19  ;;  %v617_v42 = vshra.s32 %v2405_v11, 16  ;;  %v2416_v62 = vsel %vm76_vm0, %v472_v55, 2147483647 }
  0xa5   :  { %3550 = vst [vmem:[#allocation25_spill] sm:$0xff] %v2405_v11  ;;  %vm441_vm11 = vcmp.eq.f32.partialorder %v2143_v20, %v2390_v43  ;;  %3551 = vst [vmem:[#allocation26_spill] sm:$0xff] %v2416_v62  ;;  %vm442_vm12 = vcmp.eq.f32.partialorder %v2148_v21, %v2392_v51  ;;  %v632_v59 = vshra.s32 %v2416_v62, 16 }
  0xa6   :  { %v2422_v54 = vcvt.s32.f32 %v617_v42  ;;  %v473_v26 = vsel %vm441_vm11, %v2294_v4, 16  ;;  %v474_v58 = vsel %vm442_vm12, %v2294_v4, 16 }
  0xa7   :  { %v2429_v11 = vsel %vm76_vm0, %v473_v26, 2147483647  ;;  %v2446_v26 = vsel %vm76_vm0, %v474_v58, 2147483647 }
  0xa8   :  { %v2411_v27 = vpop.xlane.xlu0 %114  ;;  %v2413_v30 = vpop.xlane.xlu1 %117  ;;  %3552 = vst [vmem:[#allocation27_spill] sm:$0xff] %v2422_v54  ;;  %605 = vmin.xlane.f32.xlu1 %v2402_v19  ;;  %620 = vmin.xlane.f32.xlu0 %v2422_v54  ;;  %3553 = vst [vmem:[#allocation28_spill] sm:$0xff] %v2429_v11  ;;  %v2439_v19 = vcvt.s32.f32 %v632_v59  ;;  %v647_v62 = vshra.s32 %v2429_v11, 16  ;;  %v662_v39 = vshra.s32 %v2446_v26, 16 }
  0xa9   :  { %vm443_vm13 = vcmp.eq.f32.partialorder %v2157_v24, %v2411_v27  ;;  %vm444_vm14 = vcmp.eq.f32.partialorder %v2162_v25, %v2413_v30  ;;  %3556 = vst [vmem:[#allocation31_spill] sm:$0xff] %v2446_v26 }
  0xaa   :  { %v475_v42 = vsel %vm443_vm13, %v2294_v4, 16  ;;  %3554 = vst [vmem:[#allocation29_spill] sm:$0xff] %v2439_v19  ;;  %v2443_v54 = vcvt.s32.f32 %v647_v62  ;;  %v476_v59 = vsel %vm444_vm14, %v2294_v4, 16  ;;  %v2461_v58 = vcvt.s32.f32 %v662_v39 }
  0xab   :  { %v2449_v46 = vsel %vm76_vm0, %v475_v42, 2147483647  ;;  %v2466_v42 = vsel %vm76_vm0, %v476_v59, 2147483647 }
  0xac   :  { %v2431_v55 = vpop.xlane.xlu0 %120  ;;  %v2433_v10 = vpop.xlane.xlu1 %123  ;;  %635 = vmin.xlane.f32.xlu1 %v2439_v19  ;;  %3555 = vst [vmem:[#allocation30_spill] sm:$0xff] %v2443_v54  ;;  %3557 = vst [vmem:[#allocation32_spill] sm:$0xff] %v2449_v46  ;;  %650 = vmin.xlane.f32.xlu0 %v2443_v54  ;;  %v677_v62 = vshra.s32 %v2449_v46, 16  ;;  %v692_v26 = vshra.s32 %v2466_v42, 16 }
  0xad   :  { %vm445_vm15 = vcmp.eq.f32.partialorder %v2171_v28, %v2431_v55  ;;  %3558 = vst [vmem:[#allocation33_spill] sm:$0xff] %v2461_v58  ;;  %3560 = vst [vmem:[#allocation35_spill] sm:$0xff] %v2466_v42  ;;  %vm446_vm1 = vcmp.eq.f32.partialorder %v2176_v29, %v2433_v10 }
  0xae   :  { %v2463_v19 = vcvt.s32.f32 %v677_v62  ;;  %v477_v54 = vsel %vm445_vm15, %v2294_v4, 16  ;;  %v2485_v59 = vcvt.s32.f32 %v692_v26 }
  0xaf   :  { %v2481_v39 = vsel %vm76_vm0, %v477_v54, 2147483647 }
  0xb0   :  { %v2452_v35 = vpop.xlane.xlu0 %126  ;;  %v2454_v38 = vpop.xlane.xlu1 %129  ;;  %3559 = vst [vmem:[#allocation34_spill] sm:$0xff] %v2463_v19  ;;  %665 = vmin.xlane.f32.xlu1 %v2461_v58  ;;  %680 = vmin.xlane.f32.xlu0 %v2463_v19  ;;  %3561 = vst [vmem:[#allocation36_spill] sm:$0xff] %v2481_v39  ;;  %v707_v62 = vshra.s32 %v2481_v39, 16  ;;  %v478_v58 = vsel %vm446_vm1, %v2294_v4, 16  ;;  %v173_v39 = vsub.f32 %v2073_v0, %v2296_v6 }
  0xb1   :  { %vm447_vm2 = vcmp.eq.f32.partialorder %v2185_v32, %v2452_v35  ;;  %vm448_vm3 = vcmp.eq.f32.partialorder %v2190_v33, %v2454_v38  ;;  %3562 = vst [vmem:[#allocation37_spill] sm:$0xff] %v2485_v59  ;;  %v2493_v19 = vsel %vm76_vm0, %v478_v58, 2147483647 }
  0xb2   :  { %v2490_v42 = vcvt.s32.f32 %v707_v62  ;;  %3564 = vst [vmem:[#allocation39_spill] sm:$0xff] %v2493_v19  ;;  %v479_v46 = vsel %vm447_vm2, %v2294_v4, 16  ;;  %v722_v26 = vshra.s32 %v2493_v19, 16  ;;  %v480_v14 = vsel %vm448_vm3, %v2294_v4, 16 }
  0xb3   :  { %v2506_v62 = vsel %vm76_vm0, %v479_v46, 2147483647  ;;  %v2514_v61 = vsel %vm76_vm0, %v480_v14, 2147483647  ;;  %v205_v60 = vmul.f32 1.442695, %v173_v39 }
  0xb4   :  { %v2473_v11 = vpop.xlane.xlu0 %132  ;;  %v2475_v23 = vpop.xlane.xlu1 %135  ;;  %695 = vmin.xlane.f32.xlu1 %v2485_v59  ;;  %3563 = vst [vmem:[#allocation38_spill] sm:$0xff] %v2490_v42  ;;  %710 = vmin.xlane.f32.xlu0 %v2490_v42  ;;  %3565 = vst [vmem:[#allocation40_spill] sm:$0xff] %v2506_v62  ;;  %v2508_v58 = vcvt.s32.f32 %v722_v26  ;;  %v737_v59 = vshra.s32 %v2506_v62, 16  ;;  %v752_v46 = vshra.s32 %v2514_v61, 16 }
  0xb5   :  { %vm449_vm4 = vcmp.eq.f32.partialorder %v2199_v36, %v2473_v11  ;;  %3567 = vst [vmem:[#allocation42_spill] sm:$0xff] %v2514_v61  ;;  %vm450_vm5 = vcmp.eq.f32.partialorder %v2204_v37, %v2475_v23  ;;  %1899 = vpow2.f32 %v205_v60 }
  0xb6   :  { %3566 = vst [vmem:[#allocation41_spill] sm:$0xff] %v2508_v58  ;;  %v2521_v42 = vcvt.s32.f32 %v737_v59  ;;  %v481_v26 = vsel %vm449_vm4, %v2294_v4, 16  ;;  %v2533_v6 = vcvt.s32.f32 %v752_v46  ;;  %v175_v59 = vsub.f32 %v2078_v1, %v2298_v7 }
  0xb7   :  { %v2530_v0 = vsel %vm76_vm0, %v481_v26, 2147483647  ;;  %v174_v1 = vsub.f32 %v2083_v2, %v2309_v15 }
  0xb8   :  { %v2496_v54 = vpop.xlane.xlu0 %138  ;;  %v2498_v22 = vpop.xlane.xlu1 %141  ;;  %725 = vmin.xlane.f32.xlu1 %v2508_v58  ;;  %3568 = vst [vmem:[#allocation43_spill] sm:$0xff] %v2521_v42  ;;  %740 = vmin.xlane.f32.xlu0 %v2521_v42  ;;  %3569 = vst [vmem:[#allocation44_spill] sm:$0xff] %v2533_v6  ;;  %v767_v14 = vshra.s32 %v2530_v0, 16  ;;  %v482_v58 = vsel %vm450_vm5, %v2294_v4, 16 }
  0xb9   :  { %vm451_vm6 = vcmp.eq.f32.partialorder %v2213_v40, %v2496_v54  ;;  %v2545_v26 = vsel %vm76_vm0, %v482_v58, 2147483647  ;;  %vm452_vm7 = vcmp.eq.f32.partialorder %v2218_v41, %v2498_v22  ;;  %v209_v58 = vmul.f32 1.442695, %v175_v59 }
  0xba   :  { %v2542_v57 = vcvt.s32.f32 %v767_v14  ;;  %3571 = vst [vmem:[#allocation46_spill] sm:$0xff] %v2545_v26  ;;  %v483_v46 = vsel %vm451_vm6, %v2294_v4, 16  ;;  %v782_v42 = vshra.s32 %v2545_v26, 16  ;;  %v176_v26 = vsub.f32 %v2092_v5, %v2311_v18 }
  0xbb   :  { %v2557_v7 = vsel %vm76_vm0, %v483_v46, 2147483647  ;;  %v484_v2 = vsel %vm452_vm7, %v2294_v4, 16  ;;  %v207_v60 = vmul.f32 1.442695, %v174_v1  ;;  %1901 = vpow2.f32 %v209_v58 }
  0xbc   :  { %v2516_v19 = vpop.xlane.xlu0 %144  ;;  %v2525_v62 = vpop.xlane.xlu1 %147  ;;  %755 = vmin.xlane.f32.xlu1 %v2533_v6  ;;  %3570 = vst [vmem:[#allocation45_spill] sm:$0xff] %v2542_v57  ;;  %770 = vmin.xlane.f32.xlu0 %v2542_v57  ;;  %v2561_v14 = vcvt.s32.f32 %v782_v42  ;;  %v797_v6 = vshra.s32 %v2557_v7, 16  ;;  %v2573_v46 = vsel %vm76_vm0, %v484_v2, 2147483647 }
  0xbd   :  { %vm453_vm8 = vcmp.eq.f32.partialorder %v2227_v44, %v2516_v19  ;;  %vm454_vm9 = vcmp.eq.f32.partialorder %v2232_v45, %v2525_v62  ;;  %3574 = vst [vmem:[#allocation49_spill] sm:$0xff] %v2573_v46  ;;  %v812_v5 = vshra.s32 %v2573_v46, 16  ;;  %1903 = vpow2.f32 %v207_v60 }
  0xbe   :  { %3572 = vst [vmem:[#allocation47_spill] sm:$0xff] %v2561_v14  ;;  %v2570_v15 = vcvt.s32.f32 %v797_v6  ;;  %v485_v42 = vsel %vm453_vm8, %v2294_v4, 16  ;;  %v177_v6 = vsub.f32 %v2101_v8, %v2327_v31  ;;  %v486_v58 = vsel %vm454_vm9, %v2294_v4, 16 }
  0xbf   :  { %v2582_v18 = vsel %vm76_vm0, %v485_v42, 2147483647  ;;  %v2590_v1 = vcvt.s32.f32 %v812_v5  ;;  %v211_v8 = vmul.f32 1.442695, %v176_v26  ;;  %v2603_v42 = vsel %vm76_vm0, %v486_v58, 2147483647  ;;  %v1900_v57 = vpop.eup %1899 }
  0xc0   :  { %v2539_v61 = vpop.xlane.xlu0 %150  ;;  %v2559_v39 = vpop.xlane.xlu1 %153  ;;  %785 = vmin.xlane.f32.xlu1 %v2561_v14  ;;  %3573 = vst [vmem:[#allocation48_spill] sm:$0xff] %v2570_v15  ;;  %3575 = vst [vmem:[#allocation50_spill] sm:$0xff] %v2582_v18  ;;  %800 = vmin.xlane.f32.xlu0 %v2570_v15  ;;  %v827_v2 = vshra.s32 %v2582_v18, 16  ;;  %v178_v5 = vsub.f32 %v2106_v9, %v2329_v34  ;;  %v842_v18 = vshra.s32 %v2603_v42, 16  ;;  %v213_v34 = vmul.f32 1.442695, %v177_v6 }
  0xc1   :  { %vm455_vm10 = vcmp.eq.f32.partialorder %v2241_v48, %v2539_v61  ;;  %vm456_vm11 = vcmp.eq.f32.partialorder %v2246_v49, %v2559_v39  ;;  %3576 = vst [vmem:[#allocation51_spill] sm:$0xff] %v2590_v1  ;;  %3578 = vst [vmem:[#allocation53_spill] sm:$0xff] %v2603_v42  ;;  %1905 = vpow2.f32 %v211_v8 }
  0xc2   :  { %v2600_v31 = vcvt.s32.f32 %v827_v2  ;;  %v487_v15 = vsel %vm455_vm10, %v2294_v4, 16  ;;  %v488_v60 = vsel %vm456_vm11, %v2294_v4, 16  ;;  %1907 = vpow2.f32 %v213_v34 }
  0xc3   :  { %v2611_v46 = vsel %vm76_vm0, %v487_v15, 2147483647  ;;  %v2625_v15 = vcvt.s32.f32 %v842_v18  ;;  %v2628_v2 = vsel %vm76_vm0, %v488_v60, 2147483647 }
  0xc4   :  { %v2576_v59 = vpop.xlane.xlu0 %156  ;;  %v2594_v14 = vpop.xlane.xlu1 %159  ;;  %3577 = vst [vmem:[#allocation52_spill] sm:$0xff] %v2600_v31  ;;  %815 = vmin.xlane.f32.xlu1 %v2590_v1  ;;  %3579 = vst [vmem:[#allocation54_spill] sm:$0xff] %v2611_v46  ;;  %830 = vmin.xlane.f32.xlu0 %v2600_v31  ;;  %v857_v26 = vshra.s32 %v2611_v46, 16  ;;  %v179_v31 = vsub.f32 %v2115_v12, %v2348_v47  ;;  %v872_v46 = vshra.s32 %v2628_v2, 16  ;;  %v215_v12 = vmul.f32 1.442695, %v178_v5 }
  0xc5   :  { %vm457_vm12 = vcmp.eq.f32.partialorder %v2255_v52, %v2576_v59  ;;  %vm458_vm13 = vcmp.eq.f32.partialorder %v2260_v53, %v2594_v14  ;;  %3580 = vst [vmem:[#allocation55_spill] sm:$0xff] %v2625_v15  ;;  %v180_v47 = vsub.f32 %v2120_v13, %v2350_v50  ;;  %v182_v13 = vsub.f32 %v2134_v17, %v2368_v3 }
  0xc6   :  { %v489_v9 = vsel %vm457_vm12, %v2294_v4, 16  ;;  %v2635_v1 = vcvt.s32.f32 %v857_v26  ;;  %v490_v18 = vsel %vm458_vm13, %v2294_v4, 16  ;;  %v2642_v6 = vcvt.s32.f32 %v872_v46 }
  0xc7   :  { %v2631_v58 = vsel %vm76_vm0, %v489_v9, 2147483647  ;;  %v2647_v9 = vsel %vm76_vm0, %v490_v18, 2147483647  ;;  %1909 = vpow2.f32 %v215_v12  ;;  %v219_v8 = vmul.f32 1.442695, %v180_v47 }
  0xc8   :  { %3581 = vst [vmem:[#allocation56_spill] sm:$0xff] %v2631_v58  ;;  %3582 = vst [vmem:[#allocation57_spill] sm:$0xff] %v2635_v1  ;;  %v887_v42 = vshra.s32 %v2631_v58, 16  ;;  %845 = vmin.xlane.f32.xlu1 %v2625_v15  ;;  %860 = vmin.xlane.f32.xlu0 %v2635_v1  ;;  %v902_v26 = vshra.s32 %v2647_v9, 16  ;;  %v1902_v58 = vpop.eup %1901  ;;  %v217_v15 = vmul.f32 1.442695, %v179_v31  ;;  %v181_v1 = vsub.f32 %v2129_v16, %v2366_v63 }
  0xc9   :  { %v183_v31 = vsub.f32 %v2143_v20, %v2390_v43  ;;  %v269_v16 = vsel %vm76_vm0, %v1900_v57, 0.0  ;;  %v223_v63 = vmul.f32 1.442695, %v182_v13  ;;  %v184_v5 = vsub.f32 %v2148_v21, %v2392_v51 }
  0xca   :  { %v2644_v60 = vcvt.s32.f32 %v887_v42  ;;  %v2655_v46 = vcvt.s32.f32 %v902_v26  ;;  %v1904_v42 = vpop.eup %1903  ;;  %1911 = vpow2.f32 %v217_v15  ;;  %v221_v50 = vmul.f32 1.442695, %v181_v1 }
  0xcb   :  { %1913 = vpow2.f32 %v219_v8  ;;  %v225_v34 = vmul.f32 1.442695, %v183_v31  ;;  %v185_v17 = vsub.f32 %v2157_v24, %v2411_v27  ;;  %v272_v3 = vsel %vm76_vm0, %v1904_v42, 0.0  ;;  %v1906_v1 = vpop.eup %1905 }
  0xcc   :  { %875 = vmin.xlane.f32.xlu1 %v2642_v6  ;;  %890 = vmin.xlane.f32.xlu0 %v2644_v60  ;;  %1915 = vpow2.f32 %v221_v50  ;;  %v275_v20 = vsel %vm76_vm0, %v1902_v58, 0.0  ;;  %v1908_v43 = vpop.eup %1907  ;;  %v227_v57 = vmul.f32 1.442695, %v184_v5  ;;  %v186_v15 = vsub.f32 %v2162_v25, %v2413_v30 }
  0xcd   :  { %1917 = vpow2.f32 %v223_v63  ;;  %v229_v21 = vmul.f32 1.442695, %v185_v17  ;;  %v187_v51 = vsub.f32 %v2171_v28, %v2431_v55  ;;  %v278_v24 = vsel %vm76_vm0, %v1906_v1, 0.0  ;;  %v2697_v1 = vpop.xlane.xlu0 %162 }
  0xce   :  { %1919 = vpow2.f32 %v225_v34  ;;  %v281_v18 = vsel %vm76_vm0, %v1908_v43, 0.0  ;;  %v231_v58 = vmul.f32 1.442695, %v186_v15  ;;  %v188_v47 = vsub.f32 %v2176_v29, %v2433_v10 }
  0xcf   :  { %1921 = vpow2.f32 %v227_v57  ;;  %v233_v25 = vmul.f32 1.442695, %v187_v51  ;;  %v189_v30 = vsub.f32 %v2185_v32, %v2452_v35  ;;  %v190_v13 = vsub.f32 %v2190_v33, %v2454_v38  ;;  %v2700_v57 = vpop.xlane.xlu1 %165 }
  0xd0   :  { %905 = vmin.xlane.f32.xlu1 %v2655_v46  ;;  %270 = vadd.xlane.f32.xlu0 %v269_v16  ;;  %1923 = vpow2.f32 %v229_v21  ;;  %v235_v8 = vmul.f32 1.442695, %v188_v47  ;;  %v191_v10 = vsub.f32 %v2199_v36, %v2473_v11  ;;  %v192_v63 = vsub.f32 %v2204_v37, %v2475_v23 }
  0xd1   :  { %v1910_v27 = vpop.eup %1909  ;;  %1925 = vpow2.f32 %v231_v58  ;;  %v237_v29 = vmul.f32 1.442695, %v189_v30  ;;  %v239_v16 = vmul.f32 1.442695, %v190_v13  ;;  %v193_v38 = vsub.f32 %v2213_v40, %v2496_v54  ;;  %v2706_v51 = vpop.xlane.xlu0 %168  ;;  %v3585_v13 = vld [vmem:[#allocation7_spill] sm:$0xff] }
  0xd2   :  { %v284_v28 = vsel %vm76_vm0, %v1910_v27, 0.0  ;;  %1927 = vpow2.f32 %v233_v25  ;;  %v241_v33 = vmul.f32 1.442695, %v191_v10  ;;  %v243_v17 = vmul.f32 1.442695, %v192_v63  ;;  %v3584_v25 = vld [vmem:[#allocation6_spill] sm:$0xff] }
  0xd3   :  { %1929 = vpow2.f32 %v235_v8  ;;  %v245_v37 = vmul.f32 1.442695, %v193_v38  ;;  %vm459_vm14 = vcmp.eq.f32.partialorder %v2269_v56, %v2697_v1  ;;  %vm461_vm1 = vcmp.eq.f32.partialorder %v3584_v25, %v2706_v51  ;;  %v2717_v30 = vpop.xlane.xlu1 %171 }
  0xd4   :  { %273 = vadd.xlane.f32.xlu1 %v272_v3  ;;  %276 = vadd.xlane.f32.xlu0 %v275_v20  ;;  %v1912_v12 = vpop.eup %1911  ;;  %1931 = vpow2.f32 %v237_v29  ;;  %v194_v3 = vsub.f32 %v2218_v41, %v2498_v22  ;;  %vm462_vm2 = vcmp.eq.f32.partialorder %v3585_v13, %v2717_v30  ;;  %v493_v29 = vsel %vm461_vm1, %v2294_v4, 16 }
  0xd5   :  { %v1914_v55 = vpop.eup %1913  ;;  %v287_v26 = vsel %vm76_vm0, %v1912_v12, 0.0  ;;  %1933 = vpow2.f32 %v239_v16  ;;  %v491_v12 = vsel %vm459_vm14, %v2294_v4, 16  ;;  %v199_v63 = vsub.f32 %v2255_v52, %v2576_v59 }
  0xd6   :  { %v1916_v42 = vpop.eup %1915  ;;  %v290_v32 = vsel %vm76_vm0, %v1914_v55, 0.0  ;;  %1935 = vpow2.f32 %v241_v33  ;;  %v247_v43 = vmul.f32 1.442695, %v194_v3  ;;  %v200_v59 = vsub.f32 %v2260_v53, %v2594_v14 }
  0xd7   :  { %v1918_v35 = vpop.eup %1917  ;;  %v293_v50 = vsel %vm76_vm0, %v1916_v42, 0.0  ;;  %1937 = vpow2.f32 %v243_v17  ;;  %v197_v42 = vsub.f32 %v2241_v48, %v2539_v61  ;;  %v198_v48 = vsub.f32 %v2246_v49, %v2559_v39 }
  0xd8   :  { %279 = vadd.xlane.f32.xlu1 %v278_v24  ;;  %282 = vadd.xlane.f32.xlu0 %v281_v18  ;;  %v1920_v31 = vpop.eup %1919  ;;  %v296_v36 = vsel %vm76_vm0, %v1918_v35, 0.0  ;;  %1939 = vpow2.f32 %v245_v37  ;;  %v195_v24 = vsub.f32 %v2227_v44, %v2516_v19  ;;  %v3583_v18 = vld [vmem:[#allocation5_spill] sm:$0xff]  ;;  %v196_v44 = vsub.f32 %v2232_v45, %v2525_v62 }
  0xd9   :  { %v1922_v11 = vpop.eup %1921  ;;  %v299_v5 = vsel %vm76_vm0, %v1920_v31, 0.0  ;;  %1941 = vpow2.f32 %v247_v43  ;;  %vm460_vm15 = vcmp.eq.f32.partialorder %v3583_v18, %v2700_v57  ;;  %v2722_v19 = vsel %vm76_vm0, %v491_v12, 2147483647 }
  0xda   :  { %v1924_v34 = vpop.eup %1923  ;;  %v302_v23 = vsel %vm76_vm0, %v1922_v11, 0.0  ;;  %v249_v55 = vmul.f32 1.442695, %v195_v24  ;;  %v917_v62 = vshra.s32 %v2722_v19, 16  ;;  %v2739_v61 = vsel %vm76_vm0, %v493_v29, 2147483647 }
  0xdb   :  { %v1926_v40 = vpop.eup %1925  ;;  %v305_v54 = vsel %vm76_vm0, %v1924_v34, 0.0  ;;  %v494_v31 = vsel %vm462_vm2, %v2294_v4, 16  ;;  %v253_v16 = vmul.f32 1.442695, %v197_v42  ;;  %v947_v39 = vshra.s32 %v2739_v61, 16  ;;  %v3586_v42 = vld [vmem:[#allocation9_spill] sm:$0xff] }
  0xdc   :  { %285 = vadd.xlane.f32.xlu1 %v284_v28  ;;  %288 = vadd.xlane.f32.xlu0 %v287_v26  ;;  %v1928_v20 = vpop.eup %1927  ;;  %v308_v15 = vsel %vm76_vm0, %v1926_v40, 0.0  ;;  %v492_v26 = vsel %vm460_vm15, %v2294_v4, 16  ;;  %1943 = vpow2.f32 %v249_v55  ;;  %v2747_v49 = vcvt.s32.f32 %v917_v62  ;;  %v3588_v62 = vld [vmem:[#allocation11_spill] sm:$0xff] }
  0xdd   :  { %v1930_v41 = vpop.eup %1929  ;;  %v311_v22 = vsel %vm76_vm0, %v1928_v20, 0.0  ;;  %v2734_v35 = vsel %vm76_vm0, %v492_v26, 2147483647  ;;  %v255_v34 = vmul.f32 1.442695, %v198_v48  ;;  %v202_v43 = vsub.f32 %v3583_v18, %v2700_v57 }
  0xde   :  { %v1932_v21 = vpop.eup %1931  ;;  %v314_v27 = vsel %vm76_vm0, %v1930_v41, 0.0  ;;  %v932_v11 = vshra.s32 %v2734_v35, 16  ;;  %v257_v52 = vmul.f32 1.442695, %v199_v63  ;;  %v259_v40 = vmul.f32 1.442695, %v200_v59 }
  0xdf   :  { %v1934_v58 = vpop.eup %1933  ;;  %v317_v47 = vsel %vm76_vm0, %v1932_v21, 0.0  ;;  %v3593_v59 = vld [vmem:[#allocation17_spill] sm:$0xff] }
  0xe0   :  { %291 = vadd.xlane.f32.xlu1 %v290_v32  ;;  %294 = vadd.xlane.f32.xlu0 %v293_v50  ;;  %v1936_v28 = vpop.eup %1935  ;;  %v320_v8 = vsel %vm76_vm0, %v1934_v58, 0.0  ;;  %v251_v50 = vmul.f32 1.442695, %v196_v44  ;;  %v2756_v3 = vcvt.s32.f32 %v932_v11 }
  0xe1   :  { %v1938_v10 = vpop.eup %1937  ;;  %v323_v32 = vsel %vm76_vm0, %v1936_v28, 0.0 }
  0xe2   :  { %v1940_v45 = vpop.eup %1939  ;;  %v326_v33 = vsel %vm76_vm0, %v1938_v10, 0.0  ;;  %1945 = vpow2.f32 %v251_v50  ;;  %v3589_v50 = vld [vmem:[#allocation13_spill] sm:$0xff] }
  0xe3   :  { %v1942_v38 = vpop.eup %1941  ;;  %1947 = vpow2.f32 %v253_v16  ;;  %v511_v48 = vand.u32 65535, %v3589_v50  ;;  %v3604_v50 = vld [vmem:[#allocation28_spill] sm:$0xff] }
  0xe4   :  { %297 = vadd.xlane.f32.xlu1 %v296_v36  ;;  %300 = vadd.xlane.f32.xlu0 %v299_v5  ;;  %v329_v36 = vsel %vm76_vm0, %v1940_v45, 0.0  ;;  %v2751_v5 = vsel %vm76_vm0, %v494_v31, 2147483647  ;;  %v332_v17 = vsel %vm76_vm0, %v1942_v38, 0.0  ;;  %1949 = vpow2.f32 %v255_v34  ;;  %v3591_v38 = vld [vmem:[#allocation14_spill] sm:$0xff] }
  0xe5   :  { %v962_v37 = vshra.s32 %v2751_v5, 16  ;;  %1951 = vpow2.f32 %v257_v52  ;;  %v3592_v52 = vld [vmem:[#allocation15_spill] sm:$0xff] }
  0xe6   :  { %v1944_v14 = vpop.eup %1943  ;;  %1953 = vpow2.f32 %v259_v40 }
  0xe7   :  { %v2765_v53 = vcvt.s32.f32 %v962_v37  ;;  %v335_v41 = vsel %vm76_vm0, %v1944_v14, 0.0  ;;  %v3594_v14 = vld [vmem:[#allocation18_spill] sm:$0xff] }
  0xe8   :  { %303 = vadd.xlane.f32.xlu1 %v302_v23  ;;  %306 = vadd.xlane.f32.xlu0 %v305_v54  ;;  %v2760_v23 = vcvt.s32.f32 %v947_v39  ;;  %v201_v54 = vsub.f32 %v2269_v56, %v2697_v1  ;;  %v263_v56 = vmul.f32 1.442695, %v202_v43  ;;  %v203_v1 = vsub.f32 %v3584_v25, %v2706_v51 }
  0xe9   :  { %v513_v39 = vcvt.s32.f32 %v511_v48  ;;  %v646_v48 = vand.u32 65535, %v3604_v50  ;;  %v3616_v50 = vld [vmem:[#allocation40_spill] sm:$0xff] }
  0xea   :  { %v261_v20 = vmul.f32 1.442695, %v201_v54  ;;  %v265_v57 = vmul.f32 1.442695, %v203_v1 }
  0xec   :  { %309 = vadd.xlane.f32.xlu1 %v308_v15  ;;  %312 = vadd.xlane.f32.xlu0 %v311_v22  ;;  %v1946_v15 = vpop.eup %1945  ;;  %1955 = vpow2.f32 %v261_v20  ;;  %v571_v20 = vand.u32 65535, %v3594_v14  ;;  %v648_v14 = vcvt.s32.f32 %v646_v48  ;;  %v736_v48 = vand.u32 65535, %v3616_v50  ;;  %v3626_v50 = vld [vmem:[#allocation50_spill] sm:$0xff] }
  0xed   :  { %v1948_v22 = vpop.eup %1947  ;;  %v338_v21 = vsel %vm76_vm0, %v1946_v15, 0.0  ;;  %1957 = vpow2.f32 %v263_v56  ;;  %v3595_v15 = vld [vmem:[#allocation16_spill] sm:$0xff] }
  0xee   :  { %v1950_v24 = vpop.eup %1949  ;;  %1959 = vpow2.f32 %v265_v57 }
  0xef   :  { %v1952_v12 = vpop.eup %1951  ;;  %v344_v18 = vsel %vm76_vm0, %v1950_v24, 0.0 }
  0xf0   :  { %315 = vadd.xlane.f32.xlu1 %v314_v27  ;;  %318 = vadd.xlane.f32.xlu0 %v317_v47  ;;  %v341_v27 = vsel %vm76_vm0, %v1948_v22, 0.0  ;;  %v347_v58 = vsel %vm76_vm0, %v1952_v12, 0.0  ;;  %v1954_v47 = vpop.eup %1953  ;;  %v3596_v22 = vld [vmem:[#allocation19_spill] sm:$0xff] }
  0xf1   :  { %v350_v51 = vsel %vm76_vm0, %v1954_v47, 0.0  ;;  %v586_v56 = vand.u32 65535, %v3596_v22 }
  0xf3   :  { %v588_v47 = vcvt.s32.f32 %v586_v56 }
  0xf4   :  { %321 = vadd.xlane.f32.xlu1 %v320_v8  ;;  %324 = vadd.xlane.f32.xlu0 %v323_v32  ;;  %v496_v8 = vand.u32 65535, %v3586_v42  ;;  %v3587_v32 = vld [vmem:[#allocation10_spill] sm:$0xff] }
  0xf5   :  { %v526_v45 = vand.u32 65535, %v3587_v32  ;;  %v3602_v42 = vld [vmem:[#allocation26_spill] sm:$0xff] }
  0xf6   :  { %v1956_v25 = vpop.eup %1955  ;;  %v498_v10 = vcvt.s32.f32 %v496_v8  ;;  %v631_v8 = vand.u32 65535, %v3602_v42 }
  0xf7   :  { %v353_v28 = vsel %vm76_vm0, %v1956_v25, 0.0  ;;  %v1958_v55 = vpop.eup %1957  ;;  %v528_v63 = vcvt.s32.f32 %v526_v45  ;;  %v3603_v45 = vld [vmem:[#allocation24_spill] sm:$0xff] }
  0xf8   :  { %327 = vadd.xlane.f32.xlu1 %v326_v33  ;;  %330 = vadd.xlane.f32.xlu0 %v329_v36  ;;  %v356_v44 = vsel %vm76_vm0, %v1958_v55, 0.0  ;;  %v1960_v26 = vpop.eup %1959  ;;  %v3590_v33 = vld [vmem:[#allocation12_spill] sm:$0xff]  ;;  %v541_v36 = vand.u32 65535, %v3591_v38  ;;  %v3601_v55 = vld [vmem:[#allocation23_spill] sm:$0xff] }
  0xf9   :  { %v359_v13 = vsel %vm76_vm0, %v1960_v26, 0.0 }
  0xfa   :  { %v543_v54 = vcvt.s32.f32 %v541_v36  ;;  %v633_v36 = vcvt.s32.f32 %v631_v8  ;;  %v3615_v8 = vld [vmem:[#allocation37_spill] sm:$0xff] }
  0xfc   :  { %333 = vadd.xlane.f32.xlu1 %v332_v17  ;;  %920 = vmin.xlane.f32.xlu0 %v2747_v49  ;;  %v556_v17 = vand.u32 65535, %v3593_v59  ;;  %v3608_v59 = vld [vmem:[#allocation32_spill] sm:$0xff] }
 0x100   :  { %935 = vmin.xlane.f32.xlu1 %v2756_v3  ;;  %950 = vmin.xlane.f32.xlu0 %v2760_v23 }
 0x104   :  { %965 = vmin.xlane.f32.xlu1 %v2765_v53  ;;  %336 = vadd.xlane.f32.xlu0 %v335_v41  ;;  %v558_v41 = vcvt.s32.f32 %v556_v17  ;;  %v676_v17 = vand.u32 65535, %v3608_v59  ;;  %v766_v59 = vand.u32 65535, %v2530_v0 }
 0x108   :  { %339 = vadd.xlane.f32.xlu1 %v338_v21  ;;  %342 = vadd.xlane.f32.xlu0 %v341_v27  ;;  %v3597_v21 = vld [vmem:[#allocation20_spill] sm:$0xff]  ;;  %v3598_v27 = vld [vmem:[#allocation21_spill] sm:$0xff] }
 0x109   :  { %v601_v12 = vand.u32 65535, %v3598_v27  ;;  %v678_v27 = vcvt.s32.f32 %v676_v17 }
 0x10c   :  { %345 = vadd.xlane.f32.xlu1 %v344_v18  ;;  %348 = vadd.xlane.f32.xlu0 %v347_v58  ;;  %v573_v58 = vcvt.s32.f32 %v571_v20  ;;  %v3609_v20 = vld [vmem:[#allocation30_spill] sm:$0xff] }
 0x110   :  { %351 = vadd.xlane.f32.xlu0 %v350_v51  ;;  %v3599_v51 = vld [vmem:[#allocation25_spill] sm:$0xff] }
 0x111   :  { %v616_v25 = vand.u32 65535, %v3599_v51  ;;  %v3613_v51 = vld [vmem:[#allocation34_spill] sm:$0xff] }
 0x114   :  { %354 = vadd.xlane.f32.xlu0 %v353_v28  ;;  %v3600_v28 = vld [vmem:[#allocation22_spill] sm:$0xff] }
 0x118   :  { %357 = vadd.xlane.f32.xlu0 %v356_v44 }
 0x11c   :  { %360 = vadd.xlane.f32.xlu0 %v359_v13 }
 0x125   :  { %v2783_v29 = vpop.xlane.xlu0 %500 }
 0x126   :  { %vm502_vm3 = vcmp.eq.f32.partialorder %v3588_v62, %v2783_v29  ;;  %v618_v62 = vcvt.s32.f32 %v616_v25  ;;  %v2052_v25 = vmov 0  }
 0x127   :  { %v503_v31 = vsel %vm502_vm3, %v498_v10, inf  ;;  %v603_v10 = vcvt.s32.f32 %v601_v12  ;;  %v3612_v12 = vld [vmem:[#allocation36_spill] sm:$0xff]  ;;  %1897 = vset.pattern.permute.xlu0 %v2052_v25  ;;  %1898 = vset.pattern.permute.xlu1 %v2052_v25 }
 0x128   :  { %504 = vmin.xlane.f32.xlu1 %v503_v31 }
 0x129   :  { %v2789_v16 = vpop.xlane.xlu0 %530  ;;  %v2794_v11 = vpop.xlane.xlu1 %515 }
 0x12a   :  { %vm532_vm4 = vcmp.eq.f32.partialorder %v3590_v33, %v2789_v16  ;;  %vm517_vm5 = vcmp.eq.f32.partialorder %v3592_v52, %v2794_v11  ;;  %v3607_v52 = vld [vmem:[#allocation29_spill] sm:$0xff] }
 0x12b   :  { %v533_v34 = vsel %vm532_vm4, %v528_v63, inf  ;;  %v518_v37 = vsel %vm517_vm5, %v513_v39, inf  ;;  %v3605_v63 = vld [vmem:[#allocation27_spill] sm:$0xff] }
 0x12c   :  { %534 = vmin.xlane.f32.xlu1 %v533_v34  ;;  %519 = vmin.xlane.f32.xlu0 %v518_v37  ;;  %v3606_v39 = vld [vmem:[#allocation31_spill] sm:$0xff] }
 0x12d   :  { %v2799_v40 = vpop.xlane.xlu1 %545  ;;  %v2802_v43 = vpop.xlane.xlu0 %560  ;;  %v661_v34 = vand.u32 65535, %v3606_v39 }
 0x12e   :  { %vm547_vm6 = vcmp.eq.f32.partialorder %v3595_v15, %v2799_v40  ;;  %vm562_vm7 = vcmp.eq.f32.partialorder %v3597_v21, %v2802_v43 }
 0x12f   :  { %v548_v1 = vsel %vm547_vm6, %v543_v54, inf  ;;  %v563_v24 = vsel %vm562_vm7, %v558_v41, inf  ;;  %v3610_v41 = vld [vmem:[#allocation35_spill] sm:$0xff] }
 0x130   :  { %549 = vmin.xlane.f32.xlu0 %v548_v1  ;;  %564 = vmin.xlane.f32.xlu1 %v563_v24  ;;  %v691_v22 = vand.u32 65535, %v3610_v41  ;;  %v663_v1 = vcvt.s32.f32 %v661_v34  ;;  %v3611_v24 = vld [vmem:[#allocation33_spill] sm:$0xff]  ;;  %v3620_v41 = vld [vmem:[#allocation43_spill] sm:$0xff] }
 0x131   :  { %v2810_v57 = vpop.xlane.xlu1 %575  ;;  %v2812_v18 = vpop.xlane.xlu0 %590 }
 0x132   :  { %vm577_vm8 = vcmp.eq.f32.partialorder %v3600_v28, %v2810_v57  ;;  %vm592_vm9 = vcmp.eq.f32.partialorder %v3601_v55, %v2812_v18 }
 0x133   :  { %v578_v44 = vsel %vm577_vm8, %v573_v58, inf  ;;  %v593_v26 = vsel %vm592_vm9, %v588_v47, inf  ;;  %v706_v58 = vand.u32 65535, %v3612_v12  ;;  %v3622_v12 = vld [vmem:[#allocation44_spill] sm:$0xff] }
 0x134   :  { %579 = vmin.xlane.f32.xlu0 %v578_v44  ;;  %594 = vmin.xlane.f32.xlu1 %v593_v26  ;;  %v693_v44 = vcvt.s32.f32 %v691_v22  ;;  %v3614_v26 = vld [vmem:[#allocation39_spill] sm:$0xff] }
 0x135   :  { %v2820_v13 = vpop.xlane.xlu1 %605  ;;  %v2822_v32 = vpop.xlane.xlu0 %620  ;;  %v721_v42 = vand.u32 65535, %v3614_v26 }
 0x136   :  { %vm607_vm10 = vcmp.eq.f32.partialorder %v3603_v45, %v2820_v13  ;;  %vm622_vm11 = vcmp.eq.f32.partialorder %v3605_v63, %v2822_v32 }
 0x137   :  { %v608_v31 = vsel %vm607_vm10, %v603_v10, inf  ;;  %v623_v33 = vsel %vm622_vm11, %v618_v62, inf  ;;  %v708_v62 = vcvt.s32.f32 %v706_v58  ;;  %v723_v34 = vcvt.s32.f32 %v721_v42 }
 0x138   :  { %609 = vmin.xlane.f32.xlu0 %v608_v31  ;;  %624 = vmin.xlane.f32.xlu1 %v623_v33  ;;  %v3617_v31 = vld [vmem:[#allocation38_spill] sm:$0xff] }
 0x139   :  { %v2829_v38 = vpop.xlane.xlu1 %635  ;;  %v2835_v37 = vpop.xlane.xlu0 %650  ;;  %v3618_v33 = vld [vmem:[#allocation42_spill] sm:$0xff] }
 0x13a   :  { %vm637_vm12 = vcmp.eq.f32.partialorder %v3607_v52, %v2829_v38  ;;  %vm652_vm13 = vcmp.eq.f32.partialorder %v3609_v20, %v2835_v37  ;;  %v3619_v52 = vld [vmem:[#allocation41_spill] sm:$0xff]  ;;  %v2027_v20 = vld [vmem:[%s3464_s0 + $0xf8] sm:$0xff] }
 0x13b   :  { %v638_v54 = vsel %vm637_vm12, %v633_v36, inf  ;;  %v653_v15 = vsel %vm652_vm13, %v648_v14, inf  ;;  %v751_v36 = vand.u32 65535, %v3618_v33  ;;  %v738_v14 = vcvt.s32.f32 %v736_v48  ;;  %v3627_v33 = vld [vmem:[#allocation48_spill] sm:$0xff] }
 0x13c   :  { %639 = vmin.xlane.f32.xlu0 %v638_v54  ;;  %654 = vmin.xlane.f32.xlu1 %v653_v15  ;;  %v204_v15 = vsub.f32 %v2027_v20, %v2717_v30  ;;  %v796_v30 = vand.u32 65535, %v2557_v7  ;;  %v826_v48 = vand.u32 65535, %v3626_v50  ;;  %v3635_v50 = vld [vmem:[#allocation56_spill] sm:$0xff] }
 0x13d   :  { %v2840_v56 = vpop.xlane.xlu1 %665  ;;  %v2842_v21 = vpop.xlane.xlu0 %680 }
 0x13e   :  { %vm667_vm14 = vcmp.eq.f32.partialorder %v3611_v24, %v2840_v56  ;;  %vm682_vm15 = vcmp.eq.f32.partialorder %v3613_v51, %v2842_v21  ;;  %v753_v24 = vcvt.s32.f32 %v751_v36  ;;  %v768_v51 = vcvt.s32.f32 %v766_v59 }
 0x13f   :  { %v668_v47 = vsel %vm667_vm14, %v663_v1, inf  ;;  %v683_v28 = vsel %vm682_vm15, %v678_v27, inf  ;;  %v3621_v27 = vld [vmem:[#allocation46_spill] sm:$0xff]  ;;  %v267_v25 = vmul.f32 1.442695, %v204_v15 }
 0x140   :  { %669 = vmin.xlane.f32.xlu0 %v668_v47  ;;  %684 = vmin.xlane.f32.xlu1 %v683_v28  ;;  %v781_v0 = vand.u32 65535, %v3621_v27  ;;  %v3623_v28 = vld [vmem:[#allocation45_spill] sm:$0xff]  ;;  %v3631_v27 = vld [vmem:[#allocation52_spill] sm:$0xff] }
 0x141   :  { %v2849_v55 = vpop.xlane.xlu1 %695  ;;  %v2854_v10 = vpop.xlane.xlu0 %710  ;;  %1961 = vpow2.f32 %v267_v25  ;;  %v3632_v25 = vld [vmem:[#allocation55_spill] sm:$0xff] }
 0x142   :  { %vm697_vm1 = vcmp.eq.f32.partialorder %v3615_v8, %v2849_v55  ;;  %vm712_vm2 = vcmp.eq.f32.partialorder %v3617_v31, %v2854_v10  ;;  %v783_v42 = vcvt.s32.f32 %v781_v0  ;;  %v3624_v8 = vld [vmem:[#allocation49_spill] sm:$0xff] }
 0x143   :  { %v698_v45 = vsel %vm697_vm1, %v693_v44, inf  ;;  %v713_v63 = vsel %vm712_vm2, %v708_v62, inf  ;;  %v3625_v62 = vld [vmem:[#allocation47_spill] sm:$0xff] }
 0x144   :  { %699 = vmin.xlane.f32.xlu0 %v698_v45  ;;  %714 = vmin.xlane.f32.xlu1 %v713_v63  ;;  %v811_v45 = vand.u32 65535, %v3624_v8  ;;  %v798_v63 = vcvt.s32.f32 %v796_v30 }
 0x145   :  { %v2860_v39 = vpop.xlane.xlu1 %725  ;;  %v2865_v17 = vpop.xlane.xlu0 %740 }
 0x146   :  { %vm727_vm3 = vcmp.eq.f32.partialorder %v3619_v52, %v2860_v39  ;;  %vm742_vm4 = vcmp.eq.f32.partialorder %v3620_v41, %v2865_v17  ;;  %v3630_v41 = vld [vmem:[#allocation51_spill] sm:$0xff] }
 0x147   :  { %v728_v54 = vsel %vm727_vm3, %v723_v34, inf  ;;  %v743_v22 = vsel %vm742_vm4, %v738_v14, inf  ;;  %v3628_v34 = vld [vmem:[#allocation53_spill] sm:$0xff]  ;;  %v3629_v14 = vld [vmem:[#allocation54_spill] sm:$0xff] }
 0x148   :  { %729 = vmin.xlane.f32.xlu0 %v728_v54  ;;  %744 = vmin.xlane.f32.xlu1 %v743_v22  ;;  %v841_v52 = vand.u32 65535, %v3628_v34  ;;  %v813_v54 = vcvt.s32.f32 %v811_v45  ;;  %v856_v20 = vand.u32 65535, %v3629_v14  ;;  %v828_v22 = vcvt.s32.f32 %v826_v48 }
 0x149   :  { %v2873_v1 = vpop.xlane.xlu1 %755  ;;  %v2878_v58 = vpop.xlane.xlu0 %770  ;;  %v886_v48 = vand.u32 65535, %v3635_v50  ;;  %v901_v34 = vand.u32 65535, %v2647_v9 }
 0x14a   :  { %vm757_vm5 = vcmp.eq.f32.partialorder %v3622_v12, %v2873_v1  ;;  %vm772_vm6 = vcmp.eq.f32.partialorder %v3623_v28, %v2878_v58  ;;  %v871_v12 = vand.u32 65535, %v2628_v2  ;;  %v858_v28 = vcvt.s32.f32 %v856_v20 }
 0x14b   :  { %v758_v47 = vsel %vm757_vm5, %v753_v24, inf  ;;  %v773_v44 = vsel %vm772_vm6, %v768_v51, inf  ;;  %v843_v51 = vcvt.s32.f32 %v841_v52  ;;  %v1962_v8 = vpop.eup %1961 }
 0x14c   :  { %759 = vmin.xlane.f32.xlu0 %v758_v47  ;;  %774 = vmin.xlane.f32.xlu1 %v773_v44  ;;  %v3633_v44 = vld [vmem:[#allocation57_spill] sm:$0xff]  ;;  %v873_v2 = vcvt.s32.f32 %v871_v12 }
 0x14d   :  { %v2883_v26 = vpop.xlane.xlu1 %785  ;;  %v2889_v31 = vpop.xlane.xlu0 %800 }
 0x14e   :  { %vm787_vm7 = vcmp.eq.f32.partialorder %v3625_v62, %v2883_v26  ;;  %vm802_vm8 = vcmp.eq.f32.partialorder %v3627_v33, %v2889_v31 }
 0x14f   :  { %v788_v7 = vsel %vm787_vm7, %v783_v42, inf  ;;  %v803_v36 = vsel %vm802_vm8, %v798_v63, inf  ;;  %v362_v63 = vsel %vm76_vm0, %v1962_v8, 0.0 }
 0x150   :  { %789 = vmin.xlane.f32.xlu0 %v788_v7  ;;  %804 = vmin.xlane.f32.xlu1 %v803_v36 }
 0x151   :  { %v2894_v59 = vpop.xlane.xlu1 %815  ;;  %v2897_v15 = vpop.xlane.xlu0 %830 }
 0x152   :  { %vm817_vm9 = vcmp.eq.f32.partialorder %v3630_v41, %v2894_v59  ;;  %vm832_vm10 = vcmp.eq.f32.partialorder %v3631_v27, %v2897_v15  ;;  %v903_v41 = vcvt.s32.f32 %v901_v34  ;;  %v931_v34 = vand.u32 65535, %v2734_v35 }
 0x153   :  { %v818_v24 = vsel %vm817_vm9, %v813_v54, inf  ;;  %v833_v0 = vsel %vm832_vm10, %v828_v22, inf  ;;  %v888_v54 = vcvt.s32.f32 %v886_v48 }
 0x154   :  { %819 = vmin.xlane.f32.xlu0 %v818_v24  ;;  %834 = vmin.xlane.f32.xlu1 %v833_v0 }
 0x155   :  { %v2904_v47 = vpop.xlane.xlu1 %845  ;;  %v2906_v30 = vpop.xlane.xlu0 %860 }
 0x156   :  { %vm847_vm11 = vcmp.eq.f32.partialorder %v3632_v25, %v2904_v47  ;;  %vm862_vm12 = vcmp.eq.f32.partialorder %v3633_v44, %v2906_v30 }
 0x157   :  { %v848_v42 = vsel %vm847_vm11, %v843_v51, inf  ;;  %v863_v45 = vsel %vm862_vm12, %v858_v28, inf }
 0x158   :  { %849 = vmin.xlane.f32.xlu0 %v848_v42  ;;  %864 = vmin.xlane.f32.xlu1 %v863_v45 }
 0x159   :  { %v2912_v62 = vpop.xlane.xlu1 %875  ;;  %v2915_v7 = vpop.xlane.xlu0 %890 }
 0x15a   :  { %3634 = vst [vmem:[#allocation5_spill] sm:$0xff] %v2912_v62  ;;  %3636 = vst [vmem:[#allocation6_spill] sm:$0xff] %v2915_v7  ;;  %vm877_vm13 = vcmp.eq.f32.partialorder %v2642_v6, %v2912_v62  ;;  %vm892_vm14 = vcmp.eq.f32.partialorder %v2644_v60, %v2915_v7 }
 0x15b   :  { %v878_v33 = vsel %vm877_vm13, %v873_v2, inf  ;;  %v893_v14 = vsel %vm892_vm14, %v888_v54, inf }
 0x15c   :  { %363 = vadd.xlane.f32.xlu0 %v362_v63  ;;  %879 = vmin.xlane.f32.xlu1 %v878_v33  ;;  %v916_v63 = vand.u32 65535, %v2722_v19  ;;  %v933_v19 = vcvt.s32.f32 %v931_v34 }
 0x15d   :  { %v2922_v36 = vpop.xlane.xlu1 %905  ;;  %v271_v52 = vpop.xlane.xlu0 %270 }
 0x15e   :  { %3637 = vst [vmem:[#allocation7_spill] sm:$0xff] %v2922_v36  ;;  %vm907_vm15 = vcmp.eq.f32.partialorder %v2655_v46, %v2922_v36  ;;  %v961_v36 = vand.u32 65535, %v2751_v5  ;;  %1963 = vrcp.f32 %v271_v52  ;;  %v44_v52 = vld [vmem:[%s3465_s1] sm:$0xff] }
 0x15f   :  { %v908_v22 = vsel %vm907_vm15, %v903_v41, inf }
 0x160   :  { %894 = vmin.xlane.f32.xlu1 %v893_v14  ;;  %v946_v14 = vand.u32 65535, %v2739_v61  ;;  %v963_v5 = vcvt.s32.f32 %v961_v36 }
 0x161   :  { %v2925_v20 = vpop.xlane.xlu1 %273  ;;  %v2929_v6 = vpop.xlane.xlu0 %276 }
 0x162   :  { %v948_v62 = vcvt.s32.f32 %v946_v14  ;;  %1965 = vrcp.f32 %v2925_v20 }
 0x163   :  { %1967 = vrcp.f32 %v2929_v6  ;;  %v567_v6 = vcvt.f32.s32 %v2802_v43 }
 0x164   :  { %909 = vmin.xlane.f32.xlu1 %v908_v22  ;;  %v918_v22 = vcvt.s32.f32 %v916_v63 }
 0x165   :  { %v2931_v60 = vpop.xlane.xlu1 %279  ;;  %v2933_v24 = vpop.xlane.xlu0 %282  ;;  %v568_v43 = vshll.u32 %v567_v6, 16 }
 0x166   :  { %1969 = vrcp.f32 %v2931_v60 }
 0x167   :  { %1971 = vrcp.f32 %v2933_v24 }
 0x169   :  { %v2935_v27 = vpop.xlane.xlu1 %285  ;;  %v2937_v9 = vpop.xlane.xlu0 %288 }
 0x16a   :  { %1973 = vrcp.f32 %v2935_v27  ;;  %v612_v27 = vcvt.f32.s32 %v2820_v13  ;;  %v50_v13 = vld [vmem:[%s3465_s1 + $0x30] sm:$0xff] }
 0x16d   :  { %v2939_v0 = vpop.xlane.xlu1 %291  ;;  %v2941_v12 = vpop.xlane.xlu0 %294 }
 0x171   :  { %v2943_v51 = vpop.xlane.xlu1 %297  ;;  %v2945_v46 = vpop.xlane.xlu0 %300 }
 0x172   :  { %1975 = vrcp.f32 %v2943_v51 }
 0x173   :  { %1977 = vrcp.f32 %v2937_v9  ;;  %v613_v9 = vshll.u32 %v612_v27, 16 }
 0x175   :  { %v2947_v25 = vpop.xlane.xlu1 %303  ;;  %v2949_v28 = vpop.xlane.xlu0 %306 }
 0x176   :  { %1979 = vrcp.f32 %v2947_v25 }
 0x177   :  { %1981 = vrcp.f32 %v2939_v0  ;;  %v51_v0 = vld [vmem:[%s3465_s1 + $0x38] sm:$0xff] }
 0x179   :  { %v2951_v44 = vpop.xlane.xlu1 %309  ;;  %v2953_v42 = vpop.xlane.xlu0 %312 }
 0x17a   :  { %1983 = vrcp.f32 %v2951_v44 }
 0x17b   :  { %1985 = vrcp.f32 %v2941_v12 }
 0x17d   :  { %v2955_v8 = vpop.xlane.xlu1 %315  ;;  %v2957_v45 = vpop.xlane.xlu0 %318 }
 0x17e   :  { %1987 = vrcp.f32 %v2955_v8 }
 0x17f   :  { %1989 = vrcp.f32 %v2945_v46 }
 0x180   :  { %1991 = vrcp.f32 %v2949_v28 }
 0x181   :  { %v2959_v2 = vpop.xlane.xlu1 %321  ;;  %v2961_v50 = vpop.xlane.xlu0 %324 }
 0x182   :  { %1993 = vrcp.f32 %v2959_v2  ;;  %v59_v2 = vld [vmem:[%s3465_s1 + $0x78] sm:$0xff] }
 0x185   :  { %v2963_v48 = vpop.xlane.xlu1 %327  ;;  %v2966_v33 = vpop.xlane.xlu0 %330 }
 0x189   :  { %v2969_v54 = vpop.xlane.xlu1 %333  ;;  %v2972_v41 = vpop.xlane.xlu0 %920 }
 0x18a   :  { %3638 = vst [vmem:[#allocation9_spill] sm:$0xff] %v2972_v41  ;;  %vm922_vm0 = vcmp.eq.f32.partialorder %v2747_v49, %v2972_v41 }
 0x18b   :  { %v923_v4 = vsel %vm922_vm0, %v918_v22, inf }
 0x18c   :  { %924 = vmin.xlane.f32.xlu1 %v923_v4 }
 0x18d   :  { %v2977_v7 = vpop.xlane.xlu1 %935  ;;  %v2981_v35 = vpop.xlane.xlu0 %950 }
 0x18e   :  { %3639 = vst [vmem:[#allocation10_spill] sm:$0xff] %v2977_v7  ;;  %vm937_vm1 = vcmp.eq.f32.partialorder %v2756_v3, %v2977_v7  ;;  %3640 = vst [vmem:[#allocation11_spill] sm:$0xff] %v2981_v35  ;;  %vm952_vm2 = vcmp.eq.f32.partialorder %v2760_v23, %v2981_v35 }
 0x18f   :  { %v938_v61 = vsel %vm937_vm1, %v933_v19, inf  ;;  %v953_v63 = vsel %vm952_vm2, %v948_v62, inf }
 0x190   :  { %939 = vmin.xlane.f32.xlu1 %v938_v61  ;;  %954 = vmin.xlane.f32.xlu0 %v953_v63 }
 0x191   :  { %v2985_v49 = vpop.xlane.xlu1 %965  ;;  %v2989_v4 = vpop.xlane.xlu0 %336 }
 0x192   :  { %3641 = vst [vmem:[#allocation13_spill] sm:$0xff] %v2985_v49  ;;  %vm967_vm3 = vcmp.eq.f32.partialorder %v2765_v53, %v2985_v49  ;;  %v507_v53 = vcvt.f32.s32 %v2783_v29  ;;  %v522_v49 = vcvt.f32.s32 %v2794_v11 }
 0x193   :  { %v968_v34 = vsel %vm967_vm3, %v963_v5, inf  ;;  %v537_v5 = vcvt.f32.s32 %v2789_v16  ;;  %v2053_v16 = vmov 0.0  }
 0x194   :  { %969 = vmin.xlane.f32.xlu1 %v968_v34  ;;  %v508_v63 = vshll.u32 %v507_v53, 16  ;;  %v523_v53 = vshll.u32 %v522_v49, 16 }
 0x195   :  { %v2991_v3 = vpop.xlane.xlu0 %342  ;;  %v2997_v23 = vpop.xlane.xlu1 %339 }
 0x199   :  { %v2993_v14 = vpop.xlane.xlu0 %348  ;;  %v3001_v19 = vpop.xlane.xlu1 %345 }
 0x19a   :  { %3642 = vst [vmem:[#allocation12_spill] sm:$0xff] %v2993_v14 }
 0x19d   :  { %v2995_v22 = vpop.xlane.xlu0 %351 }
 0x19e   :  { %3643 = vst [vmem:[#allocation14_spill] sm:$0xff] %v2995_v22 }
 0x1a1   :  { %v2999_v62 = vpop.xlane.xlu0 %354 }
 0x1a2   :  { %3644 = vst [vmem:[#allocation15_spill] sm:$0xff] %v2999_v62  ;;  %v3014_v62 = vpop.eup %1963  ;;  %1995 = vrcp.f32 %v2953_v42 }
 0x1a5   :  { %v3003_v36 = vpop.xlane.xlu0 %357 }
 0x1a6   :  { %3645 = vst [vmem:[#allocation17_spill] sm:$0xff] %v3003_v36  ;;  %v538_v36 = vshll.u32 %v537_v5, 16 }
 0x1a9   :  { %v3009_v35 = vpop.xlane.xlu0 %360 }
 0x1aa   :  { %3646 = vst [vmem:[#allocation18_spill] sm:$0xff] %v3009_v35 }
 0x1b5   :  { %v505_v61 = vpop.xlane.xlu1 %504 }
 0x1b6   :  { %v506_v34 = vcvt.f32.s32 %v505_v61  ;;  %v552_v61 = vcvt.f32.s32 %v2799_v40 }
 0x1b8   :  { %v509_v7 = vadd.s32 %v508_v63, %v506_v34  ;;  %v553_v40 = vshll.u32 %v552_v61, 16  ;;  %v3028_v34 = vpop.eup %1965  ;;  %1997 = vrcp.f32 %v2963_v48 }
 0x1b9   :  { %v535_v41 = vpop.xlane.xlu1 %534  ;;  %v520_v20 = vpop.xlane.xlu0 %519 }
 0x1ba   :  { %vm975_vm4 = vcmp.eq.s32.totalorder %v509_v7, %v44_v52  ;;  %v536_v29 = vcvt.f32.s32 %v535_v41  ;;  %v521_v14 = vcvt.f32.s32 %v520_v20  ;;  %v46_v7 = vld [vmem:[%s3465_s1 + $0x10] sm:$0xff]  ;;  %v45_v41 = vld [vmem:[%s3465_s1 + $0x8] sm:$0xff] }
 0x1bb   :  { %v1766_v11 = vsel %vm975_vm4, 1.0, %v2053_v16 }
 0x1bc   :  { %v1170_v35 = vsub.f32 %v3014_v62, %v1766_v11  ;;  %v539_v22 = vadd.s32 %v538_v36, %v536_v29  ;;  %v524_v49 = vadd.s32 %v523_v53, %v521_v14  ;;  %v47_v11 = vld [vmem:[%s3465_s1 + $0x18] sm:$0xff] }
 0x1bd   :  { %v550_v63 = vpop.xlane.xlu0 %549  ;;  %v565_v36 = vpop.xlane.xlu1 %564 }
 0x1be   :  { %1524 = vperm.xlu0 %1897, %v1170_v35   ;;  %vm977_vm5 = vcmp.eq.s32.totalorder %v539_v22, %v46_v7  ;;  %vm976_vm6 = vcmp.eq.s32.totalorder %v524_v49, %v45_v41  ;;  %v551_v5 = vcvt.f32.s32 %v550_v63  ;;  %v566_v29 = vcvt.f32.s32 %v565_v36  ;;  %v3038_v7 = vpop.eup %1967  ;;  %v48_v41 = vld [vmem:[%s3465_s1 + $0x20] sm:$0xff] }
 0x1bf   :  { %v1767_v52 = vsel %vm976_vm6, 1.0, %v2053_v16  ;;  %v582_v35 = vcvt.f32.s32 %v2810_v57  ;;  %v1768_v22 = vsel %vm977_vm5, 1.0, %v2053_v16  ;;  %v597_v49 = vcvt.f32.s32 %v2812_v18  ;;  %v49_v18 = vld [vmem:[%s3465_s1 + $0x28] sm:$0xff] }
 0x1c0   :  { %v1171_v60 = vsub.f32 %v3028_v34, %v1767_v52  ;;  %v554_v14 = vadd.s32 %v553_v40, %v551_v5  ;;  %v569_v53 = vadd.s32 %v568_v43, %v566_v29  ;;  %v1172_v63 = vsub.f32 %v3038_v7, %v1768_v22  ;;  %v3048_v52 = vpop.eup %1969 }
 0x1c1   :  { %v595_v20 = vpop.xlane.xlu1 %594  ;;  %v580_v61 = vpop.xlane.xlu0 %579  ;;  %v583_v57 = vshll.u32 %v582_v35, 16  ;;  %v642_v29 = vcvt.f32.s32 %v2829_v38  ;;  %v598_v43 = vshll.u32 %v597_v49, 16  ;;  %1999 = vrcp.f32 %v2957_v45 }
 0x1c2   :  { %vm978_vm7 = vcmp.eq.s32.totalorder %v554_v14, %v47_v11  ;;  %1529 = vperm.xlu1 %1898, %v1171_v60   ;;  %v581_v6 = vcvt.f32.s32 %v580_v61  ;;  %vm979_vm8 = vcmp.eq.s32.totalorder %v569_v53, %v48_v41  ;;  %v596_v40 = vcvt.f32.s32 %v595_v20  ;;  %v3059_v53 = vpop.eup %1971 }
 0x1c3   :  { %v1769_v24 = vsel %vm978_vm7, 1.0, %v2053_v16  ;;  %v1770_v51 = vsel %vm979_vm8, 1.0, %v2053_v16  ;;  %v627_v60 = vcvt.f32.s32 %v2822_v32  ;;  %v643_v20 = vshll.u32 %v642_v29, 16 }
 0x1c4   :  { %v584_v36 = vadd.s32 %v583_v57, %v581_v6  ;;  %v1173_v35 = vsub.f32 %v3048_v52, %v1769_v24  ;;  %v599_v14 = vadd.s32 %v598_v43, %v596_v40  ;;  %v672_v41 = vcvt.f32.s32 %v2840_v56  ;;  %v53_v57 = vld [vmem:[%s3465_s1 + $0x48] sm:$0xff] }
 0x1c5   :  { %v610_v5 = vpop.xlane.xlu0 %609  ;;  %v625_v11 = vpop.xlane.xlu1 %624  ;;  %v1174_v32 = vsub.f32 %v3059_v53, %v1770_v51  ;;  %v628_v24 = vshll.u32 %v627_v60, 16  ;;  %v657_v56 = vcvt.f32.s32 %v2835_v37  ;;  %v55_v60 = vld [vmem:[%s3465_s1 + $0x58] sm:$0xff]  ;;  %2001 = vrcp.f32 %v2969_v54  ;;  %v60_v54 = vld [vmem:[%s3465_s1 + $0x80] sm:$0xff] }
 0x1c6   :  { %1534 = vperm.xlu1 %1898, %v1172_v63   ;;  %vm980_vm9 = vcmp.eq.s32.totalorder %v584_v36, %v49_v18  ;;  %v611_v22 = vcvt.f32.s32 %v610_v5  ;;  %v626_v25 = vcvt.f32.s32 %v625_v11  ;;  %vm981_vm10 = vcmp.eq.s32.totalorder %v599_v14, %v50_v13  ;;  %v3072_v36 = vpop.eup %1973 }
 0x1c7   :  { %v1771_v49 = vsel %vm980_vm9, 1.0, %v2053_v16  ;;  %v702_v5 = vcvt.f32.s32 %v2849_v55  ;;  %v3080_v18 = vpop.eup %1975  ;;  %v673_v11 = vshll.u32 %v672_v41, 16  ;;  %v1772_v37 = vsel %vm981_vm10, 1.0, %v2053_v16 }
 0x1c8   :  { %v614_v40 = vadd.s32 %v613_v9, %v611_v22  ;;  %v1175_v43 = vsub.f32 %v3072_v36, %v1771_v49  ;;  %v629_v55 = vadd.s32 %v628_v24, %v626_v25  ;;  %v52_v22 = vld [vmem:[%s3465_s1 + $0x40] sm:$0xff]  ;;  %v658_v12 = vshll.u32 %v657_v56, 16 }
 0x1c9   :  { %v640_v38 = vpop.xlane.xlu0 %639  ;;  %v655_v6 = vpop.xlane.xlu1 %654  ;;  %v687_v14 = vcvt.f32.s32 %v2842_v21  ;;  %v703_v13 = vshll.u32 %v702_v5, 16  ;;  %v732_v9 = vcvt.f32.s32 %v2860_v39  ;;  %v57_v39 = vld [vmem:[%s3465_s1 + $0x68] sm:$0xff]  ;;  %2003 = vrcp.f32 %v2961_v50 }
 0x1ca   :  { %1539 = vperm.xlu1 %1898, %v1173_v35   ;;  %v641_v61 = vcvt.f32.s32 %v640_v38  ;;  %vm982_vm12 = vcmp.eq.s32.totalorder %v614_v40, %v51_v0  ;;  %v656_v38 = vcvt.f32.s32 %v655_v6  ;;  %vm983_vm14 = vcmp.eq.s32.totalorder %v629_v55, %v52_v22  ;;  %v54_v0 = vld [vmem:[%s3465_s1 + $0x50] sm:$0xff]  ;;  %v56_v22 = vld [vmem:[%s3465_s1 + $0x60] sm:$0xff] }
 0x1cb   :  { %v1773_v6 = vsel %vm982_vm12, 1.0, %v2053_v16  ;;  %v688_v46 = vshll.u32 %v687_v14, 16  ;;  %v733_v40 = vshll.u32 %v732_v9, 16  ;;  %v747_v55 = vcvt.f32.s32 %v2865_v17 }
 0x1cc   :  { %v644_v63 = vadd.s32 %v643_v20, %v641_v61  ;;  %v3094_v61 = vpop.eup %1977  ;;  %v659_v8 = vadd.s32 %v658_v12, %v656_v38  ;;  %2005 = vrcp.f32 %v2997_v23 }
 0x1cd   :  { %v670_v29 = vpop.xlane.xlu0 %669  ;;  %v685_v35 = vpop.xlane.xlu1 %684  ;;  %2007 = vrcp.f32 %v2991_v3 }
 0x1ce   :  { %1544 = vperm.xlu1 %1898, %v1174_v32   ;;  %vm984_vm11 = vcmp.eq.s32.totalorder %v644_v63, %v53_v57  ;;  %v671_v51 = vcvt.f32.s32 %v670_v29  ;;  %v1176_v32 = vsub.f32 %v3094_v61, %v1772_v37  ;;  %v3100_v49 = vpop.eup %1979  ;;  %v686_v63 = vcvt.f32.s32 %v685_v35 }
 0x1cf   :  { %v1775_v27 = vsel %vm984_vm11, 1.0, %v2053_v16  ;;  %v3110_v5 = vpop.eup %1981  ;;  %v717_v29 = vcvt.f32.s32 %v2854_v10  ;;  %v1774_v10 = vsel %vm983_vm14, 1.0, %v2053_v16  ;;  %vm985_vm0 = vcmp.eq.s32.totalorder %v659_v8, %v54_v0 }
 0x1d0   :  { %v1179_v44 = vsub.f32 %v3080_v18, %v1775_v27  ;;  %v674_v20 = vadd.s32 %v673_v11, %v671_v51  ;;  %v762_v11 = vcvt.f32.s32 %v2873_v1  ;;  %v3120_v35 = vpop.eup %1983  ;;  %v777_v8 = vcvt.f32.s32 %v2878_v58 }
 0x1d1   :  { %v700_v41 = vpop.xlane.xlu0 %699  ;;  %v715_v25 = vpop.xlane.xlu1 %714  ;;  %2009 = vrcp.f32 %v2966_v33  ;;  %v64_v33 = vld [vmem:[%s3465_s1 + $0xa0] sm:$0xff] }
 0x1d2   :  { %1549 = vperm.xlu1 %1898, %v1175_v43   ;;  %1569 = vperm.xlu0 %1897, %v1179_v44   ;;  %vm986_vm13 = vcmp.eq.s32.totalorder %v674_v20, %v55_v60  ;;  %v701_v57 = vcvt.f32.s32 %v700_v41  ;;  %v1177_v43 = vsub.f32 %v3110_v5, %v1773_v6  ;;  %v716_v51 = vcvt.f32.s32 %v715_v25  ;;  %v3129_v38 = vpop.eup %1985  ;;  %v58_v6 = vld [vmem:[%s3465_s1 + $0x70] sm:$0xff]  ;;  %v61_v25 = vld [vmem:[%s3465_s1 + $0x88] sm:$0xff] }
 0x1d3   :  { %v1777_v21 = vsel %vm986_vm13, 1.0, %v2053_v16  ;;  %v689_v44 = vadd.s32 %v688_v46, %v686_v63  ;;  %v718_v20 = vshll.u32 %v717_v29, 16  ;;  %v763_v14 = vshll.u32 %v762_v11, 16 }
 0x1d4   :  { %v1181_v24 = vsub.f32 %v3100_v49, %v1777_v21  ;;  %v704_v56 = vadd.s32 %v703_v13, %v701_v57  ;;  %v792_v13 = vcvt.f32.s32 %v2883_v26  ;;  %v1178_v9 = vsub.f32 %v3129_v38, %v1774_v10  ;;  %v3141_v57 = vpop.eup %1987 }
 0x1d5   :  { %v730_v27 = vpop.xlane.xlu0 %729  ;;  %v745_v60 = vpop.xlane.xlu1 %744  ;;  %v719_v17 = vadd.s32 %v718_v20, %v716_v51  ;;  %vm987_vm2 = vcmp.eq.s32.totalorder %v689_v44, %v56_v22  ;;  %v778_v51 = vshll.u32 %v777_v8, 16  ;;  %v852_v22 = vcvt.f32.s32 %v2904_v47 }
 0x1d6   :  { %1554 = vperm.xlu1 %1898, %v1176_v32   ;;  %vm988_vm15 = vcmp.eq.s32.totalorder %v704_v56, %v57_v39  ;;  %1579 = vperm.xlu0 %1897, %v1181_v24   ;;  %v731_v37 = vcvt.f32.s32 %v730_v27  ;;  %v1776_v32 = vsel %vm985_vm0, 1.0, %v2053_v16  ;;  %v746_v26 = vcvt.f32.s32 %v745_v60  ;;  %v3150_v39 = vpop.eup %1989 }
 0x1d7   :  { %v1779_v28 = vsel %vm988_vm15, 1.0, %v2053_v16  ;;  %v748_v56 = vshll.u32 %v747_v55, 16  ;;  %v793_v46 = vshll.u32 %v792_v13, 16  ;;  %v1180_v29 = vsub.f32 %v3150_v39, %v1776_v32 }
 0x1d8   :  { %v1183_v1 = vsub.f32 %v3120_v35, %v1779_v28  ;;  %v734_v12 = vadd.s32 %v733_v40, %v731_v37  ;;  %v3156_v40 = vpop.eup %1991  ;;  %v1778_v0 = vsel %vm987_vm2, 1.0, %v2053_v16  ;;  %vm989_vm3 = vcmp.eq.s32.totalorder %v719_v17, %v58_v6 }
 0x1d9   :  { %v760_v41 = vpop.xlane.xlu0 %759  ;;  %v775_v21 = vpop.xlane.xlu1 %774  ;;  %v822_v28 = vcvt.f32.s32 %v2894_v59  ;;  %v807_v60 = vcvt.f32.s32 %v2889_v31  ;;  %v837_v59 = vcvt.f32.s32 %v2897_v15  ;;  %v62_v15 = vld [vmem:[%s3465_s1 + $0x90] sm:$0xff]  ;;  %v867_v17 = vcvt.f32.s32 %v2906_v30 }
 0x1da   :  { %1559 = vperm.xlu1 %1898, %v1177_v43   ;;  %1589 = vperm.xlu0 %1897, %v1183_v1   ;;  %vm990_vm1 = vcmp.eq.s32.totalorder %v734_v12, %v59_v2  ;;  %v761_v42 = vcvt.f32.s32 %v760_v41  ;;  %v3161_v58 = vpop.eup %1993  ;;  %v749_v43 = vadd.s32 %v748_v56, %v746_v26  ;;  %v776_v27 = vcvt.f32.s32 %v775_v21  ;;  %v63_v1 = vld [vmem:[%s3465_s1 + $0x98] sm:$0xff]  ;;  %v65_v26 = vld [vmem:[%s3465_s1 + $0xa8] sm:$0xff] }
 0x1db   :  { %v1781_v48 = vsel %vm990_vm1, 1.0, %v2053_v16  ;;  %v1182_v2 = vsub.f32 %v3156_v40, %v1778_v0  ;;  %v3175_v55 = vpop.eup %1995  ;;  %v1780_v12 = vsel %vm989_vm3, 1.0, %v2053_v16  ;;  %v808_v32 = vshll.u32 %v807_v60, 16 }
 0x1dc   :  { %v1185_v63 = vsub.f32 %v3141_v57, %v1781_v48  ;;  %v764_v24 = vadd.s32 %v763_v14, %v761_v42  ;;  %v3182_v14 = vpop.eup %1997  ;;  %vm991_vm5 = vcmp.eq.s32.totalorder %v749_v43, %v60_v54  ;;  %v779_v31 = vadd.s32 %v778_v51, %v776_v27  ;;  %v67_v51 = vld [vmem:[%s3465_s1 + $0xb8] sm:$0xff]  ;;  %v68_v54 = vld [vmem:[%s3465_s1 + $0xc0] sm:$0xff] }
 0x1dd   :  { %v790_v11 = vpop.xlane.xlu0 %789  ;;  %v805_v44 = vpop.xlane.xlu1 %804  ;;  %v1184_v42 = vsub.f32 %v3175_v55, %v1780_v12  ;;  %v838_v3 = vshll.u32 %v837_v59, 16  ;;  %v1782_v48 = vsel %vm991_vm5, 1.0, %v2053_v16  ;;  %v853_v8 = vshll.u32 %v852_v22, 16  ;;  %v3649_v22 = vld [vmem:[#allocation12_spill] sm:$0xff]  ;;  %v66_v12 = vld [vmem:[%s3465_s1 + $0xb0] sm:$0xff] }
 0x1de   :  { %1564 = vperm.xlu1 %1898, %v1178_v9   ;;  %vm992_vm4 = vcmp.eq.s32.totalorder %v764_v24, %v61_v25  ;;  %1599 = vperm.xlu0 %1897, %v1185_v63   ;;  %v791_v45 = vcvt.f32.s32 %v790_v11  ;;  %v806_v50 = vcvt.f32.s32 %v805_v44  ;;  %v823_v9 = vshll.u32 %v822_v28, 16  ;;  %v3198_v25 = vpop.eup %1999 }
 0x1df   :  { %v1783_v10 = vsel %vm992_vm4, 1.0, %v2053_v16  ;;  %vm993_vm7 = vcmp.eq.s32.totalorder %v779_v31, %v62_v15  ;;  %v3200_v56 = vpop.eup %2001  ;;  %2011 = vrcp.f32 %v3001_v19  ;;  %v868_v43 = vshll.u32 %v867_v17, 16 }
 0x1e0   :  { %v1187_v37 = vsub.f32 %v3161_v58, %v1783_v10  ;;  %v794_v20 = vadd.s32 %v793_v46, %v791_v45  ;;  %v809_v30 = vadd.s32 %v808_v32, %v806_v50  ;;  %v3647_v46 = vld [vmem:[#allocation5_spill] sm:$0xff]  ;;  %v1186_v27 = vsub.f32 %v3198_v25, %v1782_v48  ;;  %v3219_v44 = vpop.eup %2003 }
 0x1e1   :  { %v820_v13 = vpop.xlane.xlu0 %819  ;;  %v835_v23 = vpop.xlane.xlu1 %834  ;;  %2013 = vrcp.f32 %v2989_v4  ;;  %v1784_v19 = vsel %vm993_vm7, 1.0, %v2053_v16  ;;  %v3648_v4 = vld [vmem:[#allocation6_spill] sm:$0xff] }
 0x1e2   :  { %1574 = vperm.xlu1 %1898, %v1180_v29   ;;  %1609 = vperm.xlu0 %1897, %v1187_v37   ;;  %vm994_vm6 = vcmp.eq.s32.totalorder %v794_v20, %v63_v1  ;;  %v821_v41 = vcvt.f32.s32 %v820_v13  ;;  %v836_v63 = vcvt.f32.s32 %v835_v23  ;;  %v882_v29 = vcvt.f32.s32 %v3647_v46  ;;  %v69_v32 = vld [vmem:[%s3465_s1 + $0xc8] sm:$0xff] }
 0x1e3   :  { %v1785_v47 = vsel %vm994_vm6, 1.0, %v2053_v16  ;;  %vm995_vm9 = vcmp.eq.s32.totalorder %v809_v30, %v64_v33  ;;  %v897_v59 = vcvt.f32.s32 %v3648_v4  ;;  %2015 = vrcp.f32 %v3649_v22  ;;  %v70_v33 = vld [vmem:[%s3465_s1 + $0xd0] sm:$0xff]  ;;  %v3653_v22 = vld [vmem:[#allocation9_spill] sm:$0xff] }
 0x1e4   :  { %v1189_v6 = vsub.f32 %v3182_v14, %v1785_v47  ;;  %v824_v21 = vadd.s32 %v823_v9, %v821_v41  ;;  %v839_v1 = vadd.s32 %v838_v3, %v836_v63  ;;  %v883_v20 = vshll.u32 %v882_v29, 16  ;;  %v3650_v3 = vld [vmem:[#allocation14_spill] sm:$0xff] }
 0x1e5   :  { %v850_v24 = vpop.xlane.xlu0 %849  ;;  %v865_v0 = vpop.xlane.xlu1 %864  ;;  %v1188_v50 = vsub.f32 %v3219_v44, %v1784_v19  ;;  %v1786_v47 = vsel %vm995_vm9, 1.0, %v2053_v16  ;;  %2017 = vrcp.f32 %v3650_v3  ;;  %v72_v3 = vld [vmem:[%s3465_s1 + $0xe0] sm:$0xff] }
 0x1e6   :  { %1584 = vperm.xlu1 %1898, %v1182_v2   ;;  %1619 = vperm.xlu0 %1897, %v1189_v6   ;;  %vm996_vm8 = vcmp.eq.s32.totalorder %v824_v21, %v65_v26  ;;  %v851_v11 = vcvt.f32.s32 %v850_v24  ;;  %v866_v45 = vcvt.f32.s32 %v865_v0  ;;  %v3221_v2 = vpop.eup %2005  ;;  %vm997_vm12 = vcmp.eq.s32.totalorder %v839_v1, %v66_v12  ;;  %v3651_v21 = vld [vmem:[#allocation7_spill] sm:$0xff] }
 0x1e7   :  { %v1787_v10 = vsel %vm996_vm8, 1.0, %v2053_v16  ;;  %v3230_v15 = vpop.eup %2007  ;;  %v898_v26 = vshll.u32 %v897_v59, 16  ;;  %v1788_v46 = vsel %vm997_vm12, 1.0, %v2053_v16  ;;  %v3652_v59 = vld [vmem:[#allocation15_spill] sm:$0xff]  ;;  %v927_v12 = vcvt.f32.s32 %v3653_v22 }
 0x1e8   :  { %v1191_v28 = vsub.f32 %v3200_v56, %v1787_v10  ;;  %v854_v37 = vadd.s32 %v853_v8, %v851_v11  ;;  %v869_v60 = vadd.s32 %v868_v43, %v866_v45  ;;  %v3240_v6 = vpop.eup %2009  ;;  %v912_v8 = vcvt.f32.s32 %v3651_v21 }
 0x1e9   :  { %v880_v31 = vpop.xlane.xlu1 %879  ;;  %v1190_v30 = vsub.f32 %v3240_v6, %v1786_v47  ;;  %v3245_v24 = vpop.eup %2011  ;;  %2019 = vrcp.f32 %v3652_v59  ;;  %v3656_v47 = vld [vmem:[#allocation11_spill] sm:$0xff]  ;;  %v1237_v59 = vmul.f32 15.0, %v3048_v52  ;;  %v1238_v22 = vmul.f32 15.0, %v3059_v53 }
 0x1ea   :  { %1594 = vperm.xlu1 %1898, %v1184_v42   ;;  %vm998_vm10 = vcmp.eq.s32.totalorder %v854_v37, %v67_v51  ;;  %1629 = vperm.xlu0 %1897, %v1191_v28   ;;  %vm999_vm11 = vcmp.eq.s32.totalorder %v869_v60, %v68_v54  ;;  %v881_v9 = vcvt.f32.s32 %v880_v31  ;;  %v913_v10 = vshll.u32 %v912_v8, 16  ;;  %v71_v54 = vld [vmem:[%s3465_s1 + $0xd8] sm:$0xff] }
 0x1eb   :  { %v1789_v13 = vsel %vm998_vm10, 1.0, %v2053_v16  ;;  %v1790_v23 = vsel %vm999_vm11, 1.0, %v2053_v16  ;;  %v3253_v43 = vpop.eup %2013  ;;  %v1234_v31 = vmul.f32 15.0, %v3014_v62 }
 0x1ec   :  { %v1193_v41 = vsub.f32 %v3221_v2, %v1789_v13  ;;  %v1194_v17 = vsub.f32 %v3230_v15, %v1790_v23  ;;  %v884_v42 = vadd.s32 %v883_v20, %v881_v9  ;;  %v1192_v45 = vsub.f32 %v3253_v43, %v1788_v46  ;;  %v3655_v13 = vld [vmem:[#allocation10_spill] sm:$0xff] }
 0x1ed   :  { %v895_v48 = vpop.xlane.xlu1 %894  ;;  %v3256_v19 = vpop.eup %2015  ;;  %v942_v9 = vcvt.f32.s32 %v3655_v13  ;;  %v957_v23 = vcvt.f32.s32 %v3656_v47  ;;  %v1235_v46 = vmul.f32 15.0, %v3028_v34 }
 0x1ee   :  { %1604 = vperm.xlu1 %1898, %v1186_v27   ;;  %1639 = vperm.xlu0 %1897, %v1193_v41   ;;  %vm1000_vm13 = vcmp.eq.s32.totalorder %v884_v42, %v69_v32  ;;  %v896_v63 = vcvt.f32.s32 %v895_v48  ;;  %v3657_v41 = vld [vmem:[#allocation18_spill] sm:$0xff]  ;;  %v364_v32 = vpop.xlane.xlu0 %363  ;;  %v1266_v48 = vceil.f32 %v1234_v31 }
 0x1ef   :  { %v1791_v29 = vsel %vm1000_vm13, 1.0, %v2053_v16  ;;  %v3263_v60 = vpop.eup %2017  ;;  %v943_v8 = vshll.u32 %v942_v9, 16  ;;  %v958_v62 = vshll.u32 %v957_v23, 16 }
 0x1f0   :  { %v1195_v0 = vsub.f32 %v3245_v24, %v1791_v29  ;;  %v899_v11 = vadd.s32 %v898_v26, %v896_v63  ;;  %v928_v26 = vshll.u32 %v927_v12, 16  ;;  %v3658_v29 = vld [vmem:[#allocation13_spill] sm:$0xff] }
 0x1f1   :  { %v910_v27 = vpop.xlane.xlu1 %909 }
 0x1f2   :  { %1614 = vperm.xlu1 %1898, %v1188_v50   ;;  %vm1001_vm14 = vcmp.eq.s32.totalorder %v899_v11, %v70_v33  ;;  %v911_v51 = vcvt.f32.s32 %v910_v27  ;;  %1649 = vperm.xlu0 %1897, %v1195_v0   ;;  %v3654_v50 = vld [vmem:[#allocation17_spill] sm:$0xff]  ;;  %v972_v33 = vcvt.f32.s32 %v3658_v29 }
 0x1f3   :  { %v1792_v28 = vsel %vm1001_vm14, 1.0, %v2053_v16  ;;  %2021 = vrcp.f32 %v3654_v50  ;;  %v3279_v27 = vpop.eup %2019 }
 0x1f4   :  { %v1196_v37 = vsub.f32 %v3256_v19, %v1792_v28  ;;  %v914_v1 = vadd.s32 %v913_v10, %v911_v51  ;;  %2023 = vrcp.f32 %v3657_v41  ;;  %v74_v51 = vld [vmem:[%s3465_s1 + $0xf0] sm:$0xff]  ;;  %v1830_v28 = vtrunc.f32 %v1266_v48 }
 0x1f5   :  { %2025 = vrcp.f32 %v364_v32  ;;  %v973_v31 = vshll.u32 %v972_v33, 16  ;;  %v1243_v48 = vmul.f32 15.0, %v3080_v18  ;;  %v1245_v18 = vmul.f32 15.0, %v3100_v49 }
 0x1f6   :  { %1624 = vperm.xlu1 %1898, %v1190_v30   ;;  %vm1002_vm15 = vcmp.eq.s32.totalorder %v914_v1, %v71_v54  ;;  %v1236_v1 = vmul.f32 15.0, %v3038_v7  ;;  %v75_v7 = vld [vmem:[%s3465_s1 + $0xf8] sm:$0xff]  ;;  %v1831_v52 = vcvt.f32.s32 %v1830_v28 }
 0x1f7   :  { %v1793_v20 = vsel %vm1002_vm15, 1.0, %v2053_v16 }
 0x1f8   :  { %v1197_v4 = vsub.f32 %v3263_v60, %v1793_v20  ;;  %v1268_v32 = vceil.f32 %v1236_v1  ;;  %v1247_v1 = vmul.f32 15.0, %v3120_v35 }
 0x1fa   :  { %1634 = vperm.xlu1 %1898, %v1192_v45   ;;  %1659 = vperm.xlu0 %1897, %v1197_v4   ;;  %v73_v45 = vld [vmem:[%s3465_s1 + $0xe8] sm:$0xff]  ;;  %v1267_v4 = vceil.f32 %v1235_v46  ;;  %v1834_v46 = vtrunc.f32 %v1268_v32  ;;  %v1249_v32 = vmul.f32 15.0, %v3141_v57  ;;  %s2054_s1 = smov [#allocation2]  }
 0x1fb   :  { %s1758_s24 = sshll.u32 %s2054_s1, 4  ;;  %s1759_s24 = int_to_ptr.vmem [resolvable:$true] %s1758_s24 }
 0x1fc   :  { %s2028_s25 = scalar_lea.vmem %s1759_s24, 16  ;;  %s2032_s26 = scalar_lea.vmem %s1759_s24, 32 }
 0x1fd   :  { %v3292_v12 = vpop.eup %2021  ;;  %p2029_p0 = scmp.ne.s32.totalorder %s1759_s24, %s2028_s25  ;;  %p2033_p1 = scmp.lt.s32.totalorder %s1759_s24, %s1759_s24 }
 0x1fe   :  { %1644 = vperm.xlu1 %1898, %v1194_v17   ;;  %v3294_v13 = vpop.eup %2023  ;;  %p2034_p2 = scmp.lt.s32.totalorder %s2032_s26, %s2028_s25 }
 0x200   :  { %p2035_p3 = por %p2034_p2, %p2033_p1 }
 0x202   :  { %1654 = vperm.xlu1 %1898, %v1196_v37   ;;  %p2036_p4 = pnand %p2035_p3, %p2029_p0 }
 0x219   :  { %v925_v42 = vpop.xlane.xlu1 %924 }
 0x21a   :  { %v926_v17 = vcvt.f32.s32 %v925_v42  ;;  %v1832_v42 = vtrunc.f32 %v1267_v4 }
 0x21c   :  { %v929_v21 = vadd.s32 %v928_v26, %v926_v17  ;;  %v1269_v26 = vceil.f32 %v1237_v59  ;;  %v1270_v17 = vceil.f32 %v1238_v22  ;;  %v1833_v29 = vcvt.f32.s32 %v1832_v42 }
 0x21d   :  { %v940_v30 = vpop.xlane.xlu1 %939  ;;  %v955_v63 = vpop.xlane.xlu0 %954  ;;  %v1277_v59 = vceil.f32 %v1245_v18 }
 0x21e   :  { %vm1003_vm0 = vcmp.eq.s32.totalorder %v929_v21, %v72_v3  ;;  %v941_v0 = vcvt.f32.s32 %v940_v30  ;;  %v956_v11 = vcvt.f32.s32 %v955_v63  ;;  %v1239_v3 = vmul.f32 15.0, %v3072_v36  ;;  %v3305_v21 = vpop.eup %2025 }
 0x21f   :  { %v1794_v10 = vsel %vm1003_vm0, 1.0, %v2053_v16  ;;  %v1798_v63 = vadd.s32 4294967295, %v1831_v52  ;;  %v1836_v33 = vtrunc.f32 %v1269_v26  ;;  %v1275_v36 = vceil.f32 %v1243_v48 }
 0x220   :  { %v1198_v34 = vsub.f32 %v3279_v27, %v1794_v10  ;;  %v944_v54 = vadd.s32 %v943_v8, %v941_v0  ;;  %v959_v37 = vadd.s32 %v958_v62, %v956_v11  ;;  %v1240_v62 = vmul.f32 15.0, %v3094_v61 }
 0x221   :  { %v970_v20 = vpop.xlane.xlu1 %969  ;;  %v1838_v0 = vtrunc.f32 %v1270_v17  ;;  %v1271_v11 = vceil.f32 %v1239_v3  ;;  %v1241_v10 = vmul.f32 15.0, %v3110_v5  ;;  %vm1362_vm4 = vcmp.gt.s32.totalorder %v1798_v63, 0 }
 0x222   :  { %vm1004_vm1 = vcmp.eq.s32.totalorder %v944_v54, %v73_v45  ;;  %vm1005_vm2 = vcmp.eq.s32.totalorder %v959_v37, %v74_v51  ;;  %v971_v50 = vcvt.f32.s32 %v970_v20  ;;  %1664 = vperm.xlu1 %1898, %v1198_v34   ;;  %v1272_v45 = vceil.f32 %v1240_v62 }
 0x223   :  { %v1795_v9 = vsel %vm1004_vm1, 1.0, %v2053_v16  ;;  %v1796_v47 = vsel %vm1005_vm2, 1.0, %v2053_v16  ;;  %v1835_v51 = vcvt.f32.s32 %v1834_v46  ;;  %v1837_v28 = vcvt.f32.s32 %v1836_v33 }
 0x224   :  { %v1199_v53 = vsub.f32 %v3292_v12, %v1795_v9  ;;  %v1200_v23 = vsub.f32 %v3294_v13, %v1796_v47  ;;  %v974_v41 = vadd.s32 %v973_v31, %v971_v50  ;;  %v1839_v61 = vcvt.f32.s32 %v1838_v0 }
 0x225   :  { %v1840_v34 = vtrunc.f32 %v1271_v11  ;;  %v1848_v54 = vtrunc.f32 %v1275_v36  ;;  %v1273_v37 = vceil.f32 %v1241_v10  ;;  %v1242_v20 = vmul.f32 15.0, %v3129_v38 }
 0x226   :  { %vm1006_vm3 = vcmp.eq.s32.totalorder %v974_v41, %v75_v7  ;;  %1669 = vperm.xlu0 %1897, %v1199_v53   ;;  %1674 = vperm.xlu1 %1898, %v1200_v23   ;;  %v1842_v4 = vtrunc.f32 %v1272_v45  ;;  %v1363_v22 = vsel %vm1362_vm4, %v1798_v63, 0  ;;  %v1800_v31 = vadd.s32 4294967295, %v1835_v51 }
 0x227   :  { %v1797_v8 = vsel %vm1006_vm3, 1.0, %v2053_v16  ;;  %v1799_v16 = vadd.s32 4294967295, %v1833_v29  ;;  %v1801_v5 = vadd.s32 4294967295, %v1837_v28  ;;  %v1802_v50 = vadd.s32 4294967295, %v1839_v61 }
 0x228   :  { %v1201_v30 = vsub.f32 %v3305_v21, %v1797_v8  ;;  %v1841_v49 = vcvt.f32.s32 %v1840_v34  ;;  %v1849_v9 = vcvt.f32.s32 %v1848_v54  ;;  %v1844_v47 = vtrunc.f32 %v1273_v37 }
 0x229   :  { %vm1364_vm5 = vcmp.gt.s32.totalorder %v1799_v16, 0  ;;  %v1279_v7 = vceil.f32 %v1247_v1  ;;  %v1274_v52 = vceil.f32 %v1242_v20  ;;  %v1843_v53 = vcvt.f32.s32 %v1842_v4 }
 0x22a   :  { %1679 = vperm.xlu0 %1897, %v1201_v30   ;;  %v1852_v23 = vtrunc.f32 %v1277_v59  ;;  %v1244_v41 = vmul.f32 15.0, %v3150_v39  ;;  %vm1426_vm6 = vcmp.lt.s32.totalorder %v1363_v22, 14  ;;  %v1365_v35 = vsel %vm1364_vm5, %v1799_v16, 0 }
 0x22b   :  { %vm1366_vm7 = vcmp.gt.s32.totalorder %v1800_v31, 0  ;;  %vm1368_vm8 = vcmp.gt.s32.totalorder %v1801_v5, 0  ;;  %vm1370_vm9 = vcmp.gt.s32.totalorder %v1802_v50, 0  ;;  %v1803_v38 = vadd.s32 4294967295, %v1841_v49 }
 0x22c   :  { %v1807_v42 = vadd.s32 4294967295, %v1849_v9  ;;  %v1845_v26 = vcvt.f32.s32 %v1844_v47  ;;  %v1856_v17 = vtrunc.f32 %v1279_v7  ;;  %v1846_v3 = vtrunc.f32 %v1274_v52 }
 0x22d   :  { %v1804_v48 = vadd.s32 4294967295, %v1843_v53  ;;  %v1853_v8 = vcvt.f32.s32 %v1852_v23  ;;  %v1276_v62 = vceil.f32 %v1244_v41  ;;  %v3316_v30 = vsel %vm1426_vm6, %v1363_v22, 14 }
 0x22e   :  { %vm1428_vm10 = vcmp.lt.s32.totalorder %v1365_v35, 14  ;;  %v1367_v63 = vsel %vm1366_vm7, %v1800_v31, 0  ;;  %v1369_v39 = vsel %vm1368_vm8, %v1801_v5, 0  ;;  %v1371_v46 = vsel %vm1370_vm9, %v1802_v50, 0 }
 0x22f   :  { %vm1372_vm11 = vcmp.gt.s32.totalorder %v1803_v38, 0  ;;  %v1281_v29 = vceil.f32 %v1249_v32  ;;  %vm1380_vm12 = vcmp.gt.s32.totalorder %v1807_v42, 0  ;;  %v1805_v33 = vadd.s32 4294967295, %v1845_v26 }
 0x230   :  { %v1857_v0 = vcvt.f32.s32 %v1856_v17  ;;  %v1847_v11 = vcvt.f32.s32 %v1846_v3  ;;  %vm1374_vm13 = vcmp.gt.s32.totalorder %v1804_v48, 0  ;;  %v1809_v36 = vadd.s32 4294967295, %v1853_v8 }
 0x231   :  { %v1850_v10 = vtrunc.f32 %v1276_v62  ;;  %v1246_v45 = vmul.f32 15.0, %v3156_v40  ;;  %v1429_v18 = vsel %vm1428_vm10, %v1365_v35, 14  ;;  %vm1430_vm14 = vcmp.lt.s32.totalorder %v1367_v63, 14 }
 0x232   :  { %vm1432_vm15 = vcmp.lt.s32.totalorder %v1369_v39, 14  ;;  %vm1434_vm0 = vcmp.lt.s32.totalorder %v1371_v46, 14  ;;  %v1373_v51 = vsel %vm1372_vm11, %v1803_v38, 0  ;;  %v1381_v16 = vsel %vm1380_vm12, %v1807_v42, 0 }
 0x233   :  { %v1860_v28 = vtrunc.f32 %v1281_v29  ;;  %v1251_v61 = vmul.f32 15.0, %v3161_v58  ;;  %v1375_v34 = vsel %vm1374_vm13, %v1804_v48, 0  ;;  %vm1376_vm1 = vcmp.gt.s32.totalorder %v1805_v33, 0  ;;  %v3659_v58 = vld [vmem:[#allocation8_spill] sm:$0xff] }
 0x234   :  { %v1811_v54 = vadd.s32 4294967295, %v1857_v0  ;;  %v1806_v37 = vadd.s32 4294967295, %v1847_v11  ;;  %vm1384_vm2 = vcmp.gt.s32.totalorder %v1809_v36, 0  ;;  %v1851_v20 = vcvt.f32.s32 %v1850_v10 }
 0x235   :  { %v1278_v4 = vceil.f32 %v1246_v45  ;;  %v1248_v59 = vmul.f32 15.0, %v3175_v55  ;;  %v1431_v40 = vsel %vm1430_vm14, %v1367_v63, 14  ;;  %v1433_v22 = vsel %vm1432_vm15, %v1369_v39, 14 }
 0x236   :  { %v3324_v31 = vsel %vm1434_vm0, %v1371_v46, 14  ;;  %vm1436_vm3 = vcmp.lt.s32.totalorder %v1373_v51, 14  ;;  %vm1490_vm4 = vcmp.eq.s32.totalorder %v3659_v58, %v3316_v30  ;;  %vm1444_vm5 = vcmp.lt.s32.totalorder %v1381_v16, 14 }
 0x237   :  { %vm1438_vm6 = vcmp.lt.s32.totalorder %v1375_v34, 14  ;;  %v1861_v5 = vcvt.f32.s32 %v1860_v28  ;;  %v1283_v50 = vceil.f32 %v1251_v61  ;;  %v1385_v49 = vsel %vm1384_vm2, %v1809_v36, 0 }
 0x238   :  { %v1377_v9 = vsel %vm1376_vm1, %v1805_v33, 0  ;;  %vm1388_vm7 = vcmp.gt.s32.totalorder %v1811_v54, 0  ;;  %vm1378_vm8 = vcmp.gt.s32.totalorder %v1806_v37, 0  ;;  %v1808_v47 = vadd.s32 4294967295, %v1851_v20 }
 0x239   :  { %v1854_v7 = vtrunc.f32 %v1278_v4  ;;  %v1280_v52 = vceil.f32 %v1248_v59  ;;  %v1250_v53 = vmul.f32 15.0, %v3198_v25  ;;  %vm1491_vm9 = vcmp.eq.s32.totalorder %v3659_v58, %v1429_v18 }
 0x23a   :  { %vm1492_vm10 = vcmp.eq.s32.totalorder %v3659_v58, %v1431_v40  ;;  %vm1493_vm11 = vcmp.eq.s32.totalorder %v3659_v58, %v1433_v22  ;;  %v1437_v23 = vsel %vm1436_vm3, %v1373_v51, 14  ;;  %vm1494_vm12 = vcmp.eq.s32.totalorder %v3659_v58, %v3324_v31 }
 0x23b   :  { %vm1448_vm13 = vcmp.lt.s32.totalorder %v1385_v49, 14  ;;  %vm1440_vm14 = vcmp.lt.s32.totalorder %v1377_v9, 14  ;;  %v1813_v41 = vadd.s32 4294967295, %v1861_v5  ;;  %v1864_v35 = vtrunc.f32 %v1283_v50 }
 0x23c   :  { %v3337_v38 = vsel %vm1444_vm5, %v1381_v16, 14  ;;  %v1439_v25 = vsel %vm1438_vm6, %v1375_v34, 14  ;;  %v1389_v32 = vsel %vm1388_vm7, %v1811_v54, 0  ;;  %v1379_v42 = vsel %vm1378_vm8, %v1806_v37, 0 }
 0x23d   :  { %v1525_v26 = vpop.permute.xlu0 %1524  ;;  %vm1495_vm15 = vcmp.eq.s32.totalorder %v3659_v58, %v1437_v23  ;;  %vm1382_vm0 = vcmp.gt.s32.totalorder %v1808_v47, 0  ;;  %v1855_v3 = vcvt.f32.s32 %v1854_v7  ;;  %v1858_v48 = vtrunc.f32 %v1280_v52 }
 0x23e   :  { %v1282_v8 = vceil.f32 %v1250_v53  ;;  %v3346_v63 = vsel %vm1448_vm13, %v1385_v49, 14  ;;  %v1441_v39 = vsel %vm1440_vm14, %v1377_v9, 14  ;;  %v1253_v46 = vmul.f32 15.0, %v3182_v14 }
 0x23f   :  { %vm1496_vm1 = vcmp.eq.s32.totalorder %v3659_v58, %v1439_v25  ;;  %vm1452_vm2 = vcmp.lt.s32.totalorder %v1389_v32, 14  ;;  %vm1442_vm3 = vcmp.lt.s32.totalorder %v1379_v42, 14  ;;  %vm1392_vm5 = vcmp.gt.s32.totalorder %v1813_v41, 0 }
 0x240   :  { %v1865_v29 = vcvt.f32.s32 %v1864_v35  ;;  %v1682_v33 = vsel %vm1490_vm4, %v1525_v26, 0.0  ;;  %v1383_v11 = vsel %vm1382_vm0, %v1808_v47, 0  ;;  %vm1497_vm6 = vcmp.eq.s32.totalorder %v3659_v58, %v1441_v39 }
 0x241   :  { %v1530_v57 = vpop.permute.xlu1 %1529  ;;  %v1810_v14 = vadd.s32 4294967295, %v1855_v3  ;;  %v1859_v45 = vcvt.f32.s32 %v1858_v48  ;;  %v1862_v18 = vtrunc.f32 %v1282_v8  ;;  %v3363_v30 = vsel %vm1452_vm2, %v1389_v32, 14 }
 0x242   :  { %v1683_v62 = vsel %vm1491_vm9, %v1530_v57, 0.0  ;;  %v1252_v57 = vmul.f32 15.0, %v3219_v44  ;;  %v1443_v28 = vsel %vm1442_vm3, %v1379_v42, 14  ;;  %v1285_v61 = vceil.f32 %v1253_v46 }
 0x243   :  { %v1714_v36 = vadd.f32 %v1683_v62, %v1682_v33  ;;  %v1393_v44 = vsel %vm1392_vm5, %v1813_v41, 0  ;;  %v1815_v54 = vadd.s32 4294967295, %v1865_v29  ;;  %v1255_v37 = vmul.f32 15.0, %v3200_v56 }
 0x244   :  { %vm1446_vm4 = vcmp.lt.s32.totalorder %v1383_v11, 14  ;;  %v1284_v20 = vceil.f32 %v1252_v57  ;;  %v1254_v4 = vmul.f32 15.0, %v3240_v6  ;;  %vm1386_vm7 = vcmp.gt.s32.totalorder %v1810_v14, 0 }
 0x245   :  { %v1535_v1 = vpop.permute.xlu1 %1534  ;;  %v1812_v22 = vadd.s32 4294967295, %v1859_v45  ;;  %v1863_v5 = vcvt.f32.s32 %v1862_v18  ;;  %vm1498_vm8 = vcmp.eq.s32.totalorder %v3659_v58, %v1443_v28  ;;  %vm1456_vm9 = vcmp.lt.s32.totalorder %v1393_v44, 14 }
 0x246   :  { %v1684_v0 = vsel %vm1492_vm10, %v1535_v1, 0.0  ;;  %v1868_v56 = vtrunc.f32 %v1285_v61  ;;  %vm1499_vm10 = vcmp.eq.s32.totalorder %v3659_v58, %v3337_v38  ;;  %v1447_v9 = vsel %vm1446_vm4, %v1383_v11, 14 }
 0x247   :  { %v1715_v34 = vadd.f32 %v1714_v36, %v1684_v0  ;;  %v1287_v6 = vceil.f32 %v1255_v37  ;;  %v1387_v47 = vsel %vm1386_vm7, %v1810_v14, 0  ;;  %v1866_v7 = vtrunc.f32 %v1284_v20 }
 0x248   :  { %v1286_v52 = vceil.f32 %v1254_v4  ;;  %v1814_v41 = vadd.s32 4294967295, %v1863_v5  ;;  %v1256_v35 = vmul.f32 15.0, %v3253_v43  ;;  %v3383_v42 = vsel %vm1456_vm9, %v1393_v44, 14 }
 0x249   :  { %v1540_v55 = vpop.permute.xlu1 %1539  ;;  %v1869_v26 = vcvt.f32.s32 %v1868_v56  ;;  %vm1501_vm13 = vcmp.eq.s32.totalorder %v3659_v58, %v3346_v63  ;;  %vm1500_vm14 = vcmp.eq.s32.totalorder %v3659_v58, %v1447_v9  ;;  %v1872_v48 = vtrunc.f32 %v1287_v6 }
 0x24a   :  { %v1685_v51 = vsel %vm1493_vm11, %v1540_v55, 0.0  ;;  %vm1396_vm11 = vcmp.gt.s32.totalorder %v1815_v54, 0  ;;  %v1867_v62 = vcvt.f32.s32 %v1866_v7  ;;  %v1870_v39 = vtrunc.f32 %v1286_v52 }
 0x24b   :  { %v1716_v59 = vadd.f32 %v1715_v34, %v1685_v51  ;;  %v3390_v43 = vsel %vm1396_vm11, %v1815_v54, 0  ;;  %vm1394_vm0 = vcmp.gt.s32.totalorder %v1814_v41, 0  ;;  %v1288_v33 = vceil.f32 %v1256_v35 }
 0x24c   :  { %v1817_v57 = vadd.s32 4294967295, %v1869_v26  ;;  %v1873_v14 = vcvt.f32.s32 %v1872_v48  ;;  %v1259_v45 = vmul.f32 15.0, %v3245_v24  ;;  %v1395_v51 = vsel %vm1394_vm0, %v1814_v41, 0 }
 0x24d   :  { %v1545_v17 = vpop.permute.xlu1 %1544  ;;  %v1816_v28 = vadd.s32 4294967295, %v1867_v62  ;;  %v1871_v61 = vcvt.f32.s32 %v1870_v39  ;;  %v1874_v54 = vtrunc.f32 %v1288_v33  ;;  %vm1460_vm7 = vcmp.lt.s32.totalorder %v3390_v43, 14 }
 0x24e   :  { %v1686_v1 = vsel %vm1494_vm12, %v1545_v17, 0.0  ;;  %vm1390_vm12 = vcmp.gt.s32.totalorder %v1812_v22, 0  ;;  %v1257_v17 = vmul.f32 15.0, %v3221_v2  ;;  %v1258_v2 = vmul.f32 15.0, %v3230_v15 }
 0x24f   :  { %v1717_v49 = vadd.f32 %v1716_v59, %v1686_v1  ;;  %v1391_v8 = vsel %vm1390_vm12, %v1812_v22, 0  ;;  %v1260_v1 = vmul.f32 15.0, %v3256_v19  ;;  %vm1400_vm5 = vcmp.gt.s32.totalorder %v1817_v57, 0 }
 0x250   :  { %v1289_v36 = vceil.f32 %v1257_v17  ;;  %vm1454_vm2 = vcmp.lt.s32.totalorder %v1391_v8, 14  ;;  %v1290_v37 = vceil.f32 %v1258_v2  ;;  %v1291_v59 = vceil.f32 %v1259_v45 }
 0x251   :  { %v1550_v10 = vpop.permute.xlu1 %1549  ;;  %v3360_v16 = vpop.permute.xlu0 %1569  ;;  %v1455_v24 = vsel %vm1454_vm2, %v1391_v8, 14  ;;  %vm1398_vm4 = vcmp.gt.s32.totalorder %v1816_v28, 0  ;;  %v1818_v22 = vadd.s32 4294967295, %v1871_v61  ;;  %v1875_v56 = vcvt.f32.s32 %v1874_v54 }
 0x252   :  { %v1687_v50 = vsel %vm1495_vm15, %v1550_v10, 0.0  ;;  %vm1450_vm15 = vcmp.lt.s32.totalorder %v1387_v47, 14  ;;  %v1691_v18 = vsel %vm1499_vm10, %v3360_v16, 0.0  ;;  %v1819_v16 = vadd.s32 4294967295, %v1873_v14 }
 0x253   :  { %v1718_v53 = vadd.f32 %v1717_v49, %v1687_v50  ;;  %v1451_v11 = vsel %vm1450_vm15, %v1387_v47, 14  ;;  %v1876_v4 = vtrunc.f32 %v1289_v36  ;;  %v1878_v49 = vtrunc.f32 %v1290_v37 }
 0x254   :  { %vm1502_vm3 = vcmp.eq.s32.totalorder %v3659_v58, %v1451_v11  ;;  %v1292_v9 = vceil.f32 %v1260_v1  ;;  %vm1404_vm9 = vcmp.gt.s32.totalorder %v1819_v16, 0  ;;  %v1880_v47 = vtrunc.f32 %v1291_v59 }
 0x255   :  { %v1555_v40 = vpop.permute.xlu1 %1554  ;;  %v1580_v31 = vpop.permute.xlu0 %1579  ;;  %vm1402_vm10 = vcmp.gt.s32.totalorder %v1818_v22, 0  ;;  %v1820_v35 = vadd.s32 4294967295, %v1875_v56  ;;  %vm1505_vm11 = vcmp.eq.s32.totalorder %v3659_v58, %v3383_v42  ;;  %v1461_v17 = vsel %vm1460_vm7, %v3390_v43, 14 }
 0x256   :  { %v1688_v55 = vsel %vm1496_vm1, %v1555_v40, 0.0  ;;  %vm1503_vm1 = vcmp.eq.s32.totalorder %v3659_v58, %v3363_v30  ;;  %v1693_v40 = vsel %vm1501_vm13, %v1580_v31, 0.0  ;;  %v1877_v31 = vcvt.f32.s32 %v1876_v4 }
 0x257   :  { %v1719_v25 = vadd.f32 %v1718_v53, %v1688_v55  ;;  %v1401_v55 = vsel %vm1400_vm5, %v1817_v57, 0  ;;  %v1399_v53 = vsel %vm1398_vm4, %v1816_v28, 0  ;;  %v1882_v26 = vtrunc.f32 %v1292_v9 }
 0x258   :  { %vm1464_vm12 = vcmp.lt.s32.totalorder %v1401_v55, 14  ;;  %v1821_v48 = vadd.s32 4294967295, %v1877_v31  ;;  %vm1462_vm13 = vcmp.lt.s32.totalorder %v1399_v53, 14  ;;  %v1881_v8 = vcvt.f32.s32 %v1880_v47 }
 0x259   :  { %v1560_v23 = vpop.permute.xlu1 %1559  ;;  %v1590_v3 = vpop.permute.xlu0 %1589  ;;  %v1405_v39 = vsel %vm1404_vm9, %v1819_v16, 0  ;;  %v1403_v42 = vsel %vm1402_vm10, %v1818_v22, 0  ;;  %vm1406_vm15 = vcmp.gt.s32.totalorder %v1820_v35, 0  ;;  %v1883_v33 = vcvt.f32.s32 %v1882_v26 }
 0x25a   :  { %v1689_v32 = vsel %vm1497_vm6, %v1560_v23, 0.0  ;;  %vm1458_vm6 = vcmp.lt.s32.totalorder %v1395_v51, 14  ;;  %v1695_v7 = vsel %vm1503_vm1, %v1590_v3, 0.0  ;;  %vm1507_vm0 = vcmp.eq.s32.totalorder %v3659_v58, %v1461_v17 }
 0x25b   :  { %v1720_v46 = vadd.f32 %v1719_v25, %v1689_v32  ;;  %v1459_v52 = vsel %vm1458_vm6, %v1395_v51, 14  ;;  %v1879_v32 = vcvt.f32.s32 %v1878_v49  ;;  %vm1408_vm1 = vcmp.gt.s32.totalorder %v1821_v48, 0 }
 0x25c   :  { %v1823_v57 = vadd.s32 4294967295, %v1881_v8  ;;  %vm1466_vm2 = vcmp.lt.s32.totalorder %v1403_v42, 14  ;;  %v1407_v14 = vsel %vm1406_vm15, %v1820_v35, 0  ;;  %v1824_v51 = vadd.s32 4294967295, %v1883_v33 }
 0x25d   :  { %v1565_v29 = vpop.permute.xlu1 %1564  ;;  %v1600_v15 = vpop.permute.xlu0 %1599  ;;  %v1822_v43 = vadd.s32 4294967295, %v1879_v32  ;;  %v1409_v28 = vsel %vm1408_vm1, %v1821_v48, 0  ;;  %v1263_v8 = vmul.f32 15.0, %v3292_v12 }
 0x25e   :  { %v1690_v0 = vsel %vm1498_vm8, %v1565_v29, 0.0  ;;  %vm1504_vm8 = vcmp.eq.s32.totalorder %v3659_v58, %v1455_v24  ;;  %v1697_v62 = vsel %vm1505_vm11, %v1600_v15, 0.0  ;;  %vm1412_vm7 = vcmp.gt.s32.totalorder %v1823_v57, 0 }
 0x25f   :  { %v1721_v10 = vadd.f32 %v1720_v46, %v1690_v0  ;;  %v1463_v0 = vsel %vm1462_vm13, %v1399_v53, 14  ;;  %vm1410_vm6 = vcmp.gt.s32.totalorder %v1822_v43, 0  ;;  %vm1472_vm9 = vcmp.lt.s32.totalorder %v1409_v28, 14 }
 0x260   :  { %vm1508_vm5 = vcmp.eq.s32.totalorder %v3659_v58, %v1463_v0  ;;  %v1411_v1 = vsel %vm1410_vm6, %v1822_v43, 0  ;;  %vm1414_vm11 = vcmp.gt.s32.totalorder %v1824_v51, 0 }
 0x261   :  { %v1575_v34 = vpop.permute.xlu1 %1574  ;;  %v1722_v44 = vadd.f32 %v1721_v10, %v1691_v18  ;;  %v1610_v19 = vpop.permute.xlu0 %1609  ;;  %v1465_v10 = vsel %vm1464_vm12, %v1401_v55, 14  ;;  %vm1474_vm13 = vcmp.lt.s32.totalorder %v1411_v1, 14 }
 0x262   :  { %v1692_v20 = vsel %vm1500_vm14, %v1575_v34, 0.0  ;;  %vm1506_vm14 = vcmp.eq.s32.totalorder %v3659_v58, %v1459_v52  ;;  %v1699_v36 = vsel %vm1507_vm0, %v1610_v19, 0.0  ;;  %v1467_v34 = vsel %vm1466_vm2, %v1403_v42, 14 }
 0x263   :  { %v1723_v38 = vadd.f32 %v1722_v44, %v1692_v20  ;;  %vm1509_vm4 = vcmp.eq.s32.totalorder %v3659_v58, %v1465_v10  ;;  %vm1510_vm10 = vcmp.eq.s32.totalorder %v3659_v58, %v1467_v34  ;;  %v1473_v19 = vsel %vm1472_vm9, %v1409_v28, 14 }
 0x264   :  { %v1475_v9 = vsel %vm1474_vm13, %v1411_v1, 14  ;;  %vm1513_vm0 = vcmp.eq.s32.totalorder %v3659_v58, %v1473_v19 }
 0x265   :  { %v1585_v5 = vpop.permute.xlu1 %1584  ;;  %v1724_v50 = vadd.f32 %v1723_v38, %v1693_v40  ;;  %v1620_v25 = vpop.permute.xlu0 %1619  ;;  %v1413_v38 = vsel %vm1412_vm7, %v1823_v57, 0  ;;  %vm1514_vm2 = vcmp.eq.s32.totalorder %v3659_v58, %v1475_v9 }
 0x266   :  { %v1694_v6 = vsel %vm1502_vm3, %v1585_v5, 0.0  ;;  %vm1468_vm3 = vcmp.lt.s32.totalorder %v1405_v39, 14  ;;  %v1701_v54 = vsel %vm1509_vm4, %v1620_v25, 0.0  ;;  %v1415_v5 = vsel %vm1414_vm11, %v1824_v51, 0 }
 0x267   :  { %v1725_v63 = vadd.f32 %v1724_v50, %v1694_v6  ;;  %v1469_v37 = vsel %vm1468_vm3, %v1405_v39, 14  ;;  %vm1478_vm1 = vcmp.lt.s32.totalorder %v1415_v5, 14  ;;  %v1262_v25 = vmul.f32 15.0, %v3279_v27 }
 0x268   :  { %vm1511_vm12 = vcmp.eq.s32.totalorder %v3659_v58, %v1469_v37  ;;  %v1479_v53 = vsel %vm1478_vm1, %v1415_v5, 14 }
 0x269   :  { %v1595_v23 = vpop.permute.xlu1 %1594  ;;  %v1726_v41 = vadd.f32 %v1725_v63, %v1695_v7  ;;  %v1630_v45 = vpop.permute.xlu0 %1629  ;;  %v1294_v48 = vceil.f32 %v1262_v25 }
 0x26a   :  { %v1696_v30 = vsel %vm1504_vm8, %v1595_v23, 0.0  ;;  %vm1470_vm8 = vcmp.lt.s32.totalorder %v1407_v14, 14  ;;  %v1703_v22 = vsel %vm1511_vm12, %v1630_v45, 0.0 }
 0x26b   :  { %v1727_v3 = vadd.f32 %v1726_v41, %v1696_v30  ;;  %v1471_v4 = vsel %vm1470_vm8, %v1407_v14, 14  ;;  %v1261_v30 = vmul.f32 15.0, %v3263_v60  ;;  %v1886_v42 = vtrunc.f32 %v1294_v48 }
 0x26c   :  { %vm1512_vm15 = vcmp.eq.s32.totalorder %v3659_v58, %v1471_v4 }
 0x26d   :  { %v1605_v46 = vpop.permute.xlu1 %1604  ;;  %v1728_v29 = vadd.f32 %v1727_v3, %v1697_v62  ;;  %v1640_v59 = vpop.permute.xlu0 %1639  ;;  %v1293_v3 = vceil.f32 %v1261_v30  ;;  %v1264_v62 = vmul.f32 15.0, %v3294_v13 }
 0x26e   :  { %v1698_v2 = vsel %vm1506_vm14, %v1605_v46, 0.0  ;;  %vm1476_vm14 = vcmp.lt.s32.totalorder %v1413_v38, 14  ;;  %v1705_v55 = vsel %vm1513_vm0, %v1640_v59, 0.0  ;;  %v1295_v46 = vceil.f32 %v1263_v8 }
 0x26f   :  { %v1729_v11 = vadd.f32 %v1728_v29, %v1698_v2  ;;  %v1477_v63 = vsel %vm1476_vm14, %v1413_v38, 14  ;;  %v1884_v39 = vtrunc.f32 %v1293_v3  ;;  %v1265_v29 = vmul.f32 15.0, %v3305_v21 }
 0x270   :  { %vm1515_vm3 = vcmp.eq.s32.totalorder %v3659_v58, %v1477_v63  ;;  %v1296_v43 = vceil.f32 %v1264_v62  ;;  %v1887_v2 = vcvt.f32.s32 %v1886_v42  ;;  %v1888_v0 = vtrunc.f32 %v1295_v46 }
 0x271   :  { %v1615_v18 = vpop.permute.xlu1 %1614  ;;  %v1730_v15 = vadd.f32 %v1729_v11, %v1699_v36  ;;  %v1650_v31 = vpop.permute.xlu0 %1649  ;;  %v1885_v33 = vcvt.f32.s32 %v1884_v39  ;;  %v1297_v11 = vceil.f32 %v1265_v29 }
 0x272   :  { %v1700_v61 = vsel %vm1508_vm5, %v1615_v18, 0.0  ;;  %v1707_v41 = vsel %vm1515_vm3, %v1650_v31, 0.0  ;;  %vm1516_vm5 = vcmp.eq.s32.totalorder %v3659_v58, %v1479_v53  ;;  %v1890_v57 = vtrunc.f32 %v1296_v43 }
 0x273   :  { %v1731_v44 = vadd.f32 %v1730_v15, %v1700_v61  ;;  %v1825_v60 = vadd.s32 4294967295, %v1885_v33  ;;  %v1826_v36 = vadd.s32 4294967295, %v1887_v2  ;;  %v1889_v27 = vcvt.f32.s32 %v1888_v0 }
 0x274   :  { %v1892_v10 = vtrunc.f32 %v1297_v11  ;;  %v1891_v14 = vcvt.f32.s32 %v1890_v57 }
 0x275   :  { %v1625_v20 = vpop.permute.xlu1 %1624  ;;  %v1732_v24 = vadd.f32 %v1731_v44, %v1701_v54  ;;  %vm1416_vm6 = vcmp.gt.s32.totalorder %v1825_v60, 0  ;;  %vm1418_vm4 = vcmp.gt.s32.totalorder %v1826_v36, 0  ;;  %v1827_v12 = vadd.s32 4294967295, %v1889_v27 }
 0x276   :  { %v1702_v16 = vsel %vm1510_vm10, %v1625_v20, 0.0  ;;  %v1893_v13 = vcvt.f32.s32 %v1892_v10  ;;  %v1828_v45 = vadd.s32 4294967295, %v1891_v14  ;;  %v1417_v18 = vsel %vm1416_vm6, %v1825_v60, 0 }
 0x277   :  { %v1733_v40 = vadd.f32 %v1732_v24, %v1702_v16  ;;  %v1419_v15 = vsel %vm1418_vm4, %v1826_v36, 0  ;;  %vm1420_vm7 = vcmp.gt.s32.totalorder %v1827_v12, 0  ;;  %vm1480_vm8 = vcmp.lt.s32.totalorder %v1417_v18, 14 }
 0x278   :  { %v1829_v21 = vadd.s32 4294967295, %v1893_v13  ;;  %vm1482_vm9 = vcmp.lt.s32.totalorder %v1419_v15, 14  ;;  %vm1422_vm10 = vcmp.gt.s32.totalorder %v1828_v45, 0  ;;  %v1421_v51 = vsel %vm1420_vm7, %v1827_v12, 0 }
 0x279   :  { %v1635_v50 = vpop.permute.xlu1 %1634  ;;  %v1734_v56 = vadd.f32 %v1733_v40, %v1703_v22  ;;  %v1481_v28 = vsel %vm1480_vm8, %v1417_v18, 14  ;;  %v1483_v61 = vsel %vm1482_vm9, %v1419_v15, 14  ;;  %v1423_v34 = vsel %vm1422_vm10, %v1828_v45, 0  ;;  %v1660_v44 = vpop.permute.xlu0 %1659 }
 0x27a   :  { %v1704_v49 = vsel %vm1512_vm15, %v1635_v50, 0.0  ;;  %vm1424_vm11 = vcmp.gt.s32.totalorder %v1829_v21, 0  ;;  %vm1484_vm12 = vcmp.lt.s32.totalorder %v1421_v51, 14  ;;  %vm1517_vm13 = vcmp.eq.s32.totalorder %v3659_v58, %v1481_v28 }
 0x27b   :  { %v1735_v6 = vadd.f32 %v1734_v56, %v1704_v49  ;;  %v1425_v54 = vsel %vm1424_vm11, %v1829_v21, 0  ;;  %vm1518_vm14 = vcmp.eq.s32.totalorder %v3659_v58, %v1483_v61  ;;  %vm1486_vm15 = vcmp.lt.s32.totalorder %v1423_v34, 14 }
 0x27c   :  { %v1709_v1 = vsel %vm1517_vm13, %v1660_v44, 0.0  ;;  %v1485_v24 = vsel %vm1484_vm12, %v1421_v51, 14  ;;  %vm1488_vm0 = vcmp.lt.s32.totalorder %v1425_v54, 14  ;;  %v1487_v16 = vsel %vm1486_vm15, %v1423_v34, 14 }
 0x27d   :  { %v1645_v47 = vpop.permute.xlu1 %1644  ;;  %v1736_v7 = vadd.f32 %v1735_v6, %v1705_v55  ;;  %vm1519_vm1 = vcmp.eq.s32.totalorder %v3659_v58, %v1485_v24  ;;  %v1489_v19 = vsel %vm1488_vm0, %v1425_v54, 14 }
 0x27e   :  { %v1706_v52 = vsel %vm1514_vm2, %v1645_v47, 0.0  ;;  %vm1520_vm2 = vcmp.eq.s32.totalorder %v3659_v58, %v1487_v16  ;;  %vm1521_vm3 = vcmp.eq.s32.totalorder %v3659_v58, %v1489_v19 }
 0x27f   :  { %v1737_v23 = vadd.f32 %v1736_v7, %v1706_v52 }
 0x281   :  { %v1655_v35 = vpop.permute.xlu1 %1654  ;;  %v1738_v32 = vadd.f32 %v1737_v23, %v1707_v41 }
 0x282   :  { %v1708_v26 = vsel %vm1516_vm5, %v1655_v35, 0.0 }
 0x283   :  { %v1739_v17 = vadd.f32 %v1738_v32, %v1708_v26 }
 0x285   :  { %v1740_v38 = vadd.f32 %v1739_v17, %v1709_v1 }
 0x2a1   :  { %v1665_v37 = vpop.permute.xlu1 %1664 }
 0x2a2   :  { %v1710_v20 = vsel %vm1518_vm14, %v1665_v37, 0.0 }
 0x2a3   :  { %v1741_v4 = vadd.f32 %v1740_v38, %v1710_v20 }
 0x2a5   :  { %v1675_v59 = vpop.permute.xlu1 %1674  ;;  %v1670_v40 = vpop.permute.xlu0 %1669 }
 0x2a6   :  { %v1711_v22 = vsel %vm1519_vm1, %v1670_v40, 0.0  ;;  %v1712_v50 = vsel %vm1520_vm2, %v1675_v59, 0.0 }
 0x2a7   :  { %v1742_v5 = vadd.f32 %v1741_v4, %v1711_v22 }
 0x2a9   :  { %v1743_v56 = vadd.f32 %v1742_v5, %v1712_v50  ;;  %v1680_v49 = vpop.permute.xlu0 %1679 }
 0x2aa   :  { %v1713_v9 = vsel %vm1521_vm3, %v1680_v49, 0.0 }
 0x2ab   :  { %v1744_v6 = vadd.f32 %v1743_v56, %v1713_v9 }
 0x2ad   :  { %v1745_v55 = vrot.slane %v1744_v6, 4 }
 0x2af   :  { %v1746_v63 = vadd.f32 %v1745_v55, %v1744_v6 }
 0x2b1   :  { %v1747_v31 = vrot.slane %v1746_v63, 2 }
 0x2b3   :  { %v1748_v47 = vadd.f32 %v1747_v31, %v1746_v63 }
 0x2b5   :  { %v1749_v7 = vrot.slane %v1748_v47, 1 }
 0x2b7   :  { %v1750_v52 = vadd.f32 %v1749_v7, %v1748_v47 }
 0x2b9   :  { %1751 = vst [vmem:[#allocation2] sm:$0x1] %v1750_v52 }
 0x2ba   :  { %2039 = shalt.err (!%p2036_p4)
}
 0x2bb   :  { %s2040_s29 = scalar_lea.hbm %s3466_s2, 16 }
 0x2bc   :  { %p2041_p5 = scmp.ne.s32.totalorder %s3466_s2, %s2040_s29  ;;  %p2044_p6 = scmp.lt.u32.totalorder %s2040_s29, %s3466_s2 }
 0x2be   :  { %p2046_p7 = pnand %p2044_p6, %p2041_p5 }
 0x2c0   :  { %2049 = shalt.err (!%p2046_p7)
}
 0x2c1   :  { %1761 = dma.vmem_to_hbm [thread:$0]  %s1759_s24, 16, %s3466_s2, [#allocation3]  }
 0x2c2   :  { %2050 = dma.done.wait [#allocation3], 16  }
 0x2c3   :  { %2051 = vsyncadd [#allocation3], 4294967280 }
 0x2c4   :  { %1765 = vsyncpa [#allocation3], 1 }

</bundles_post_ra>
